<compile_context>
chip_gen: v6e
topology: v6e:2x2x1
jax: 0.10.0
libtpu: 0.0.40
codegen_flags: <defaults>
</compile_context>

<pallas_src>
import math
from functools import partial

import jax
import jax.numpy as jnp
from jax.experimental import pallas as pl
from jax.experimental.pallas import tpu as pltpu


# Custom LayerNorm eps used by the reference encoder implementation.
# TODO(synk): set to 1e-5 if the reference model uses torch.nn.LayerNorm defaults.
LN_EPS = 1e-12


def _layernorm(x, gamma, beta, eps):
    """LayerNorm over the last dim with biased variance (matches reference)."""
    mean = jnp.mean(x, axis=-1, keepdims=True)
    var = jnp.mean(jnp.square(x - mean), axis=-1, keepdims=True)
    return (x - mean) * jax.lax.rsqrt(var + jnp.float32(eps)) * gamma + beta


# ---------------------------------------------------------------------------
# Single fully fused forward kernel (no grid: everything resident in VMEM)
# ---------------------------------------------------------------------------

def _fused_transformer_kernel(x_ref, ew_ref, eb_ref, wqkv_ref, wproj_ref,
                              vec_ref, fcw_ref, fcb_ref, o_ref,
                              *, batch, seq, num_heads, num_layers, eps,
                              emb_scale):
    f32 = jnp.float32
    # TODO(synk): for large hidden sizes, cast matmul operands to bf16 (keep
    # preferred_element_type=f32); kept f32 here for reference parity.

    # --- input embedding: (xW + b) * sqrt(D) ---
    x = x_ref[...].astype(f32)                                   # (B*S, Din)
    h = jnp.dot(x, ew_ref[...].astype(f32), preferred_element_type=f32)
    h = (h + eb_ref[...].astype(f32)) * f32(emb_scale)           # (B*S, D)

    D = h.shape[-1]
    dh = D // num_heads

    for l in range(num_layers):                                  # static unroll
        wqkv = wqkv_ref[l].astype(f32)                           # (D, 3D), Q pre-scaled
        wp = wproj_ref[l].astype(f32)                            # (3, D, D)
        wo, w1, w2 = wp[0], wp[1], wp[2]
        vec = vec_ref[l].astype(f32)                             # (10, D)

        # --- fused QKV projection over all B*S rows ---
        qkv = jnp.dot(h, wqkv, preferred_element_type=f32)       # (B*S, 3D)
        q = qkv[:, 0 * D:1 * D] + vec[0:1]   # bias_q (pre-scaled by 1/sqrt(dh))
        k = qkv[:, 1 * D:2 * D] + vec[1:2]
        v = qkv[:, 2 * D:3 * D] + vec[2:3]

        # --- scaled dot-product attention: static loops over batch & heads,
        #     all head outputs register-resident (no scratch, no sliced stores)
        batch_outs = []
        for b in range(batch):
            r0, r1 = b * seq, (b + 1) * seq
            head_outs = []
            for hd in range(num_heads):
                c0, c1 = hd * dh, (hd + 1) * dh
                qh = q[r0:r1, c0:c1]
                kh = k[r0:r1, c0:c1]
                vh = v[r0:r1, c0:c1]
                # q @ k^T without materializing a transpose; scale already
                # folded into Wq/bq.
                s = jax.lax.dot_general(qh, kh, (((1,), (1,)), ((), ())),
                                        preferred_element_type=f32)  # (S, S)
                s = s - jnp.max(s, axis=-1, keepdims=True)
                p = jnp.exp(s)
                p = p / jnp.sum(p, axis=-1, keepdims=True)           # exact softmax
                head_outs.append(jnp.dot(p, vh, preferred_element_type=f32))
            batch_outs.append(jnp.concatenate(head_outs, axis=-1))  # (S, D)
        attn = jnp.concatenate(batch_outs, axis=0)                   # (B*S, D)

        # --- output projection + residual + LayerNorm 1 ---
        a = jnp.dot(attn, wo, preferred_element_type=f32) + vec[3:4]
        h1 = _layernorm(a + h, vec[4:5], vec[5:6], eps)

        # --- position-wise FFN + residual + LayerNorm 2 ---
        ff = jnp.dot(h1, w1, preferred_element_type=f32) + vec[6:7]
        ff = jnp.maximum(ff, 0.0)
        ff = jnp.dot(ff, w2, preferred_element_type=f32) + vec[7:8]
        h = _layernorm(ff + h1, vec[8:9], vec[9:10], eps)

    # --- last-token rows + fc projection ---
    last = jnp.concatenate(
        [h[(b + 1) * seq - 1:(b + 1) * seq, :] for b in range(batch)], axis=0)
    out = jnp.dot(last, fcw_ref[...].astype(f32), preferred_element_type=f32)
    out = out + fcb_ref[...].astype(f32)
    o_ref[...] = out.astype(o_ref.dtype)


def transformer_forward(params, x, *, num_heads):
    """Full Transformer forward in one pallas_call."""
    B, S, Din = x.shape
    D = params["emb_w"].shape[1]
    L = params["wqkv"].shape[0]
    out_dim = params["fc_w"].shape[1]

    kernel = partial(_fused_transformer_kernel,
                     batch=B, seq=S, num_heads=num_heads, num_layers=L,
                     eps=float(LN_EPS), emb_scale=math.sqrt(D))

    # No grid: all inputs are small enough to live whole in VMEM; defaults give
    # full-array VMEM blocks and a single kernel invocation.
    return pl.pallas_call(
        kernel,
        out_shape=jax.ShapeDtypeStruct((B, out_dim), jnp.float32),
    )(x.reshape(B * S, Din),
      params["emb_w"], params["emb_b"],
      params["wqkv"], params["wproj"], params["vec"],
      params["fc_w"], params["fc_b"])


# ---------------------------------------------------------------------------
# Parameters (deterministic, PyTorch-Linear-style uniform init)
# ---------------------------------------------------------------------------

def _lin_init(key, fan_in, fan_out):
    kw, kb = jax.random.split(key)
    bound = 1.0 / math.sqrt(fan_in)
    w = jax.random.uniform(kw, (fan_in, fan_out), jnp.float32, -bound, bound)
    b = jax.random.uniform(kb, (fan_out,), jnp.float32, -bound, bound)
    return w, b


def init_params(key, input_dim, hidden_dim, num_layers, output_dim, num_heads):
    assert hidden_dim % num_heads == 0
    dh = hidden_dim // num_heads
    attn_scale = 1.0 / math.sqrt(dh)   # folded into Wq / bq

    keys = jax.random.split(key, 2 + num_layers)
    emb_w, emb_b = _lin_init(keys[0], input_dim, hidden_dim)
    fc_w, fc_b = _lin_init(keys[1], hidden_dim, output_dim)

    ones = jnp.ones((hidden_dim,), jnp.float32)
    zeros = jnp.zeros((hidden_dim,), jnp.float32)

    wqkv_all, wproj_all, vec_all = [], [], []
    for l in range(num_layers):
        lk = jax.random.split(keys[2 + l], 6)
        wq, bq = _lin_init(lk[0], hidden_dim, hidden_dim)
        wk, bk = _lin_init(lk[1], hidden_dim, hidden_dim)
        wv, bv = _lin_init(lk[2], hidden_dim, hidden_dim)
        wo, bo = _lin_init(lk[3], hidden_dim, hidden_dim)
        # ffn_hidden == hidden_dim per the reference constructor.
        w1, b1 = _lin_init(lk[4], hidden_dim, hidden_dim)
        w2, b2 = _lin_init(lk[5], hidden_dim, hidden_dim)

        # Fused QKV with the attention scale pre-folded into the Q columns/bias.
        wqkv_all.append(jnp.concatenate([wq * attn_scale, wk, wv], axis=1))
        wproj_all.append(jnp.stack([wo, w1, w2], axis=0))          # (3, D, D)
        vec_all.append(jnp.stack([bq * attn_scale, bk, bv, bo,
                                  ones, zeros,          # LN1 gamma/beta
                                  b1, b2,
                                  ones, zeros], axis=0))           # (10, D)

    return {
        "emb_w": emb_w,
        "emb_b": emb_b.reshape(1, hidden_dim),
        "wqkv": jnp.stack(wqkv_all, axis=0),    # (L, D, 3D)
        "wproj": jnp.stack(wproj_all, axis=0),  # (L, 3, D, D)
        "vec": jnp.stack(vec_all, axis=0),      # (L, 10, D)
        "fc_w": fc_w,
        "fc_b": fc_b.reshape(1, output_dim),
    }


# ---------------------------------------------------------------------------
# Main
# ---------------------------------------------------------------------------

if __name__ == "__main__":
    input_dim, hidden_dim, num_layers = 4, 32, 2
    output_dim, num_heads, dropout = 3, 4, 0.0
    B, S = 2, 8

    key = jax.random.PRNGKey(0)
    kx, kp = jax.random.split(key)
    x = jax.random.normal(kx, (B, S, input_dim), jnp.float32)
    params = init_params(kp, input_dim, hidden_dim, num_layers, output_dim,
                         num_heads)

    # TODO(synk): dropout is stochastic only in training; treated as identity here.
    fwd = jax.jit(partial(transformer_forward, num_heads=num_heads))
    out = fwd(params, x)
    jax.block_until_ready(out)

    assert out.shape == (B, output_dim), out.shape
    assert jnp.all(jnp.isfinite(out))
    print("KERNEL_OK")
</pallas_src>

<mosaic_0001>
module attributes {stable_mosaic.version = 11 : i64} {
  func.func @_fused_transformer_kernel(%arg0: memref<16x4xf32, #tpu.memory_space<vmem>>, %arg1: memref<4x32xf32, #tpu.memory_space<vmem>>, %arg2: memref<1x32xf32, #tpu.memory_space<vmem>>, %arg3: memref<2x32x96xf32, #tpu.memory_space<vmem>>, %arg4: memref<2x3x32x32xf32, #tpu.memory_space<vmem>>, %arg5: memref<2x10x32xf32, #tpu.memory_space<vmem>>, %arg6: memref<32x3xf32, #tpu.memory_space<vmem>>, %arg7: memref<1x3xf32, #tpu.memory_space<vmem>>, %arg8: memref<2x3xf32, #tpu.memory_space<vmem>>) attributes {dimension_semantics = [], scalar_prefetch = 0 : i64, scratch_operands = 0 : i64, tpu.core_type = #tpu.core_type<tc>} {
    %c0 = arith.constant 0 : index
    %c0_0 = arith.constant 0 : index
    %0 = vector.load %arg0[%c0, %c0_0] : memref<16x4xf32, #tpu.memory_space<vmem>>, vector<16x4xf32>
    %c0_1 = arith.constant 0 : index
    %c0_2 = arith.constant 0 : index
    %1 = vector.load %arg1[%c0_1, %c0_2] : memref<4x32xf32, #tpu.memory_space<vmem>>, vector<4x32xf32>
    %cst = arith.constant dense<0.000000e+00> : vector<16x32xf32>
    %2 = tpu.matmul %0, %1, %cst {dimension_numbers = #tpu.dot_dimension_numbers<[1], [0], [0], [1], [0, 0, 1, 1], [], []>} : vector<16x4xf32>, vector<4x32xf32>, vector<16x32xf32> -> vector<16x32xf32>
    %c0_3 = arith.constant 0 : index
    %c0_4 = arith.constant 0 : index
    %3 = vector.load %arg2[%c0_3, %c0_4] : memref<1x32xf32, #tpu.memory_space<vmem>>, vector<1x32xf32>
    %4 = vector.broadcast %3 : vector<1x32xf32> to vector<16x32xf32>
    %5 = arith.addf %2, %4 : vector<16x32xf32>
    %cst_5 = arith.constant 5.65685415 : f32
    %6 = vector.broadcast %cst_5 : f32 to vector<16x32xf32>
    %7 = arith.mulf %5, %6 : vector<16x32xf32>
    %c0_6 = arith.constant 0 : index
    %c0_7 = arith.constant 0 : index
    %c0_8 = arith.constant 0 : index
    %8 = vector.load %arg3[%c0_6, %c0_7, %c0_8] : memref<2x32x96xf32, #tpu.memory_space<vmem>>, vector<1x32x96xf32>
    %9 = vector.shape_cast %8 : vector<1x32x96xf32> to vector<32x96xf32>
    %c0_9 = arith.constant 0 : index
    %c0_10 = arith.constant 0 : index
    %c0_11 = arith.constant 0 : index
    %c0_12 = arith.constant 0 : index
    %10 = vector.load %arg4[%c0_9, %c0_10, %c0_11, %c0_12] : memref<2x3x32x32xf32, #tpu.memory_space<vmem>>, vector<1x3x32x32xf32>
    %11 = vector.shape_cast %10 : vector<1x3x32x32xf32> to vector<3x32x32xf32>
    %12 = vector.extract_strided_slice %11 {offsets = [0, 0, 0], sizes = [1, 32, 32], strides = [1, 1, 1]} : vector<3x32x32xf32> to vector<1x32x32xf32>
    %13 = vector.shape_cast %12 : vector<1x32x32xf32> to vector<32x32xf32>
    %14 = vector.extract_strided_slice %11 {offsets = [1, 0, 0], sizes = [1, 32, 32], strides = [1, 1, 1]} : vector<3x32x32xf32> to vector<1x32x32xf32>
    %15 = vector.shape_cast %14 : vector<1x32x32xf32> to vector<32x32xf32>
    %16 = vector.extract_strided_slice %11 {offsets = [2, 0, 0], sizes = [1, 32, 32], strides = [1, 1, 1]} : vector<3x32x32xf32> to vector<1x32x32xf32>
    %17 = vector.shape_cast %16 : vector<1x32x32xf32> to vector<32x32xf32>
    %c0_13 = arith.constant 0 : index
    %c0_14 = arith.constant 0 : index
    %c0_15 = arith.constant 0 : index
    %18 = vector.load %arg5[%c0_13, %c0_14, %c0_15] : memref<2x10x32xf32, #tpu.memory_space<vmem>>, vector<1x10x32xf32>
    %19 = vector.shape_cast %18 : vector<1x10x32xf32> to vector<10x32xf32>
    %cst_16 = arith.constant dense<0.000000e+00> : vector<16x96xf32>
    %20 = tpu.matmul %7, %9, %cst_16 {dimension_numbers = #tpu.dot_dimension_numbers<[1], [0], [0], [1], [0, 0, 1, 1], [], []>} : vector<16x32xf32>, vector<32x96xf32>, vector<16x96xf32> -> vector<16x96xf32>
    %21 = vector.extract_strided_slice %20 {offsets = [0, 0], sizes = [16, 32], strides = [1, 1]} : vector<16x96xf32> to vector<16x32xf32>
    %22 = vector.extract_strided_slice %19 {offsets = [0, 0], sizes = [1, 32], strides = [1, 1]} : vector<10x32xf32> to vector<1x32xf32>
    %23 = vector.broadcast %22 : vector<1x32xf32> to vector<16x32xf32>
    %24 = arith.addf %21, %23 : vector<16x32xf32>
    %25 = vector.extract_strided_slice %20 {offsets = [0, 32], sizes = [16, 32], strides = [1, 1]} : vector<16x96xf32> to vector<16x32xf32>
    %26 = vector.extract_strided_slice %19 {offsets = [1, 0], sizes = [1, 32], strides = [1, 1]} : vector<10x32xf32> to vector<1x32xf32>
    %27 = vector.broadcast %26 : vector<1x32xf32> to vector<16x32xf32>
    %28 = arith.addf %25, %27 : vector<16x32xf32>
    %29 = vector.extract_strided_slice %20 {offsets = [0, 64], sizes = [16, 32], strides = [1, 1]} : vector<16x96xf32> to vector<16x32xf32>
    %30 = vector.extract_strided_slice %19 {offsets = [2, 0], sizes = [1, 32], strides = [1, 1]} : vector<10x32xf32> to vector<1x32xf32>
    %31 = vector.broadcast %30 : vector<1x32xf32> to vector<16x32xf32>
    %32 = arith.addf %29, %31 : vector<16x32xf32>
    %33 = vector.extract_strided_slice %24 {offsets = [0, 0], sizes = [8, 8], strides = [1, 1]} : vector<16x32xf32> to vector<8x8xf32>
    %34 = vector.extract_strided_slice %28 {offsets = [0, 0], sizes = [8, 8], strides = [1, 1]} : vector<16x32xf32> to vector<8x8xf32>
    %35 = vector.extract_strided_slice %32 {offsets = [0, 0], sizes = [8, 8], strides = [1, 1]} : vector<16x32xf32> to vector<8x8xf32>
    %cst_17 = arith.constant dense<0.000000e+00> : vector<8x8xf32>
    %36 = tpu.matmul %33, %34, %cst_17 {dimension_numbers = #tpu.dot_dimension_numbers<[1], [1], [0], [0], [0, 0, 1, 0], [], []>} : vector<8x8xf32>, vector<8x8xf32>, vector<8x8xf32> -> vector<8x8xf32>
    %cst_18 = arith.constant dense<0xFF800000> : vector<8xf32>
    %37 = vector.multi_reduction <maximumf>, %36, %cst_18 [1] : vector<8x8xf32> to vector<8xf32>
    %38 = vector.shape_cast %37 : vector<8xf32> to vector<8x1xf32>
    %39 = vector.broadcast %38 : vector<8x1xf32> to vector<8x8xf32>
    %40 = arith.subf %36, %39 : vector<8x8xf32>
    %41 = math.exp %40 : vector<8x8xf32>
    %cst_19 = arith.constant dense<0.000000e+00> : vector<8xf32>
    %42 = vector.multi_reduction <add>, %41, %cst_19 [1] : vector<8x8xf32> to vector<8xf32>
    %43 = vector.shape_cast %42 : vector<8xf32> to vector<8x1xf32>
    %44 = vector.broadcast %43 : vector<8x1xf32> to vector<8x8xf32>
    %45 = arith.divf %41, %44 : vector<8x8xf32>
    %cst_20 = arith.constant dense<0.000000e+00> : vector<8x8xf32>
    %46 = tpu.matmul %45, %35, %cst_20 {dimension_numbers = #tpu.dot_dimension_numbers<[1], [0], [0], [1], [0, 0, 1, 1], [], []>} : vector<8x8xf32>, vector<8x8xf32>, vector<8x8xf32> -> vector<8x8xf32>
    %47 = vector.extract_strided_slice %24 {offsets = [0, 8], sizes = [8, 8], strides = [1, 1]} : vector<16x32xf32> to vector<8x8xf32>
    %48 = vector.extract_strided_slice %28 {offsets = [0, 8], sizes = [8, 8], strides = [1, 1]} : vector<16x32xf32> to vector<8x8xf32>
    %49 = vector.extract_strided_slice %32 {offsets = [0, 8], sizes = [8, 8], strides = [1, 1]} : vector<16x32xf32> to vector<8x8xf32>
    %cst_21 = arith.constant dense<0.000000e+00> : vector<8x8xf32>
    %50 = tpu.matmul %47, %48, %cst_21 {dimension_numbers = #tpu.dot_dimension_numbers<[1], [1], [0], [0], [0, 0, 1, 0], [], []>} : vector<8x8xf32>, vector<8x8xf32>, vector<8x8xf32> -> vector<8x8xf32>
    %cst_22 = arith.constant dense<0xFF800000> : vector<8xf32>
    %51 = vector.multi_reduction <maximumf>, %50, %cst_22 [1] : vector<8x8xf32> to vector<8xf32>
    %52 = vector.shape_cast %51 : vector<8xf32> to vector<8x1xf32>
    %53 = vector.broadcast %52 : vector<8x1xf32> to vector<8x8xf32>
    %54 = arith.subf %50, %53 : vector<8x8xf32>
    %55 = math.exp %54 : vector<8x8xf32>
    %cst_23 = arith.constant dense<0.000000e+00> : vector<8xf32>
    %56 = vector.multi_reduction <add>, %55, %cst_23 [1] : vector<8x8xf32> to vector<8xf32>
    %57 = vector.shape_cast %56 : vector<8xf32> to vector<8x1xf32>
    %58 = vector.broadcast %57 : vector<8x1xf32> to vector<8x8xf32>
    %59 = arith.divf %55, %58 : vector<8x8xf32>
    %cst_24 = arith.constant dense<0.000000e+00> : vector<8x8xf32>
    %60 = tpu.matmul %59, %49, %cst_24 {dimension_numbers = #tpu.dot_dimension_numbers<[1], [0], [0], [1], [0, 0, 1, 1], [], []>} : vector<8x8xf32>, vector<8x8xf32>, vector<8x8xf32> -> vector<8x8xf32>
    %61 = vector.extract_strided_slice %24 {offsets = [0, 16], sizes = [8, 8], strides = [1, 1]} : vector<16x32xf32> to vector<8x8xf32>
    %62 = vector.extract_strided_slice %28 {offsets = [0, 16], sizes = [8, 8], strides = [1, 1]} : vector<16x32xf32> to vector<8x8xf32>
    %63 = vector.extract_strided_slice %32 {offsets = [0, 16], sizes = [8, 8], strides = [1, 1]} : vector<16x32xf32> to vector<8x8xf32>
    %cst_25 = arith.constant dense<0.000000e+00> : vector<8x8xf32>
    %64 = tpu.matmul %61, %62, %cst_25 {dimension_numbers = #tpu.dot_dimension_numbers<[1], [1], [0], [0], [0, 0, 1, 0], [], []>} : vector<8x8xf32>, vector<8x8xf32>, vector<8x8xf32> -> vector<8x8xf32>
    %cst_26 = arith.constant dense<0xFF800000> : vector<8xf32>
    %65 = vector.multi_reduction <maximumf>, %64, %cst_26 [1] : vector<8x8xf32> to vector<8xf32>
    %66 = vector.shape_cast %65 : vector<8xf32> to vector<8x1xf32>
    %67 = vector.broadcast %66 : vector<8x1xf32> to vector<8x8xf32>
    %68 = arith.subf %64, %67 : vector<8x8xf32>
    %69 = math.exp %68 : vector<8x8xf32>
    %cst_27 = arith.constant dense<0.000000e+00> : vector<8xf32>
    %70 = vector.multi_reduction <add>, %69, %cst_27 [1] : vector<8x8xf32> to vector<8xf32>
    %71 = vector.shape_cast %70 : vector<8xf32> to vector<8x1xf32>
    %72 = vector.broadcast %71 : vector<8x1xf32> to vector<8x8xf32>
    %73 = arith.divf %69, %72 : vector<8x8xf32>
    %cst_28 = arith.constant dense<0.000000e+00> : vector<8x8xf32>
    %74 = tpu.matmul %73, %63, %cst_28 {dimension_numbers = #tpu.dot_dimension_numbers<[1], [0], [0], [1], [0, 0, 1, 1], [], []>} : vector<8x8xf32>, vector<8x8xf32>, vector<8x8xf32> -> vector<8x8xf32>
    %75 = vector.extract_strided_slice %24 {offsets = [0, 24], sizes = [8, 8], strides = [1, 1]} : vector<16x32xf32> to vector<8x8xf32>
    %76 = vector.extract_strided_slice %28 {offsets = [0, 24], sizes = [8, 8], strides = [1, 1]} : vector<16x32xf32> to vector<8x8xf32>
    %77 = vector.extract_strided_slice %32 {offsets = [0, 24], sizes = [8, 8], strides = [1, 1]} : vector<16x32xf32> to vector<8x8xf32>
    %cst_29 = arith.constant dense<0.000000e+00> : vector<8x8xf32>
    %78 = tpu.matmul %75, %76, %cst_29 {dimension_numbers = #tpu.dot_dimension_numbers<[1], [1], [0], [0], [0, 0, 1, 0], [], []>} : vector<8x8xf32>, vector<8x8xf32>, vector<8x8xf32> -> vector<8x8xf32>
    %cst_30 = arith.constant dense<0xFF800000> : vector<8xf32>
    %79 = vector.multi_reduction <maximumf>, %78, %cst_30 [1] : vector<8x8xf32> to vector<8xf32>
    %80 = vector.shape_cast %79 : vector<8xf32> to vector<8x1xf32>
    %81 = vector.broadcast %80 : vector<8x1xf32> to vector<8x8xf32>
    %82 = arith.subf %78, %81 : vector<8x8xf32>
    %83 = math.exp %82 : vector<8x8xf32>
    %cst_31 = arith.constant dense<0.000000e+00> : vector<8xf32>
    %84 = vector.multi_reduction <add>, %83, %cst_31 [1] : vector<8x8xf32> to vector<8xf32>
    %85 = vector.shape_cast %84 : vector<8xf32> to vector<8x1xf32>
    %86 = vector.broadcast %85 : vector<8x1xf32> to vector<8x8xf32>
    %87 = arith.divf %83, %86 : vector<8x8xf32>
    %cst_32 = arith.constant dense<0.000000e+00> : vector<8x8xf32>
    %88 = tpu.matmul %87, %77, %cst_32 {dimension_numbers = #tpu.dot_dimension_numbers<[1], [0], [0], [1], [0, 0, 1, 1], [], []>} : vector<8x8xf32>, vector<8x8xf32>, vector<8x8xf32> -> vector<8x8xf32>
    %89 = tpu.concatenate %46, %60, %74, %88 in 1 : vector<8x8xf32>, vector<8x8xf32>, vector<8x8xf32>, vector<8x8xf32> -> vector<8x32xf32>
    %90 = vector.extract_strided_slice %24 {offsets = [8, 0], sizes = [8, 8], strides = [1, 1]} : vector<16x32xf32> to vector<8x8xf32>
    %91 = vector.extract_strided_slice %28 {offsets = [8, 0], sizes = [8, 8], strides = [1, 1]} : vector<16x32xf32> to vector<8x8xf32>
    %92 = vector.extract_strided_slice %32 {offsets = [8, 0], sizes = [8, 8], strides = [1, 1]} : vector<16x32xf32> to vector<8x8xf32>
    %cst_33 = arith.constant dense<0.000000e+00> : vector<8x8xf32>
    %93 = tpu.matmul %90, %91, %cst_33 {dimension_numbers = #tpu.dot_dimension_numbers<[1], [1], [0], [0], [0, 0, 1, 0], [], []>} : vector<8x8xf32>, vector<8x8xf32>, vector<8x8xf32> -> vector<8x8xf32>
    %cst_34 = arith.constant dense<0xFF800000> : vector<8xf32>
    %94 = vector.multi_reduction <maximumf>, %93, %cst_34 [1] : vector<8x8xf32> to vector<8xf32>
    %95 = vector.shape_cast %94 : vector<8xf32> to vector<8x1xf32>
    %96 = vector.broadcast %95 : vector<8x1xf32> to vector<8x8xf32>
    %97 = arith.subf %93, %96 : vector<8x8xf32>
    %98 = math.exp %97 : vector<8x8xf32>
    %cst_35 = arith.constant dense<0.000000e+00> : vector<8xf32>
    %99 = vector.multi_reduction <add>, %98, %cst_35 [1] : vector<8x8xf32> to vector<8xf32>
    %100 = vector.shape_cast %99 : vector<8xf32> to vector<8x1xf32>
    %101 = vector.broadcast %100 : vector<8x1xf32> to vector<8x8xf32>
    %102 = arith.divf %98, %101 : vector<8x8xf32>
    %cst_36 = arith.constant dense<0.000000e+00> : vector<8x8xf32>
    %103 = tpu.matmul %102, %92, %cst_36 {dimension_numbers = #tpu.dot_dimension_numbers<[1], [0], [0], [1], [0, 0, 1, 1], [], []>} : vector<8x8xf32>, vector<8x8xf32>, vector<8x8xf32> -> vector<8x8xf32>
    %104 = vector.extract_strided_slice %24 {offsets = [8, 8], sizes = [8, 8], strides = [1, 1]} : vector<16x32xf32> to vector<8x8xf32>
    %105 = vector.extract_strided_slice %28 {offsets = [8, 8], sizes = [8, 8], strides = [1, 1]} : vector<16x32xf32> to vector<8x8xf32>
    %106 = vector.extract_strided_slice %32 {offsets = [8, 8], sizes = [8, 8], strides = [1, 1]} : vector<16x32xf32> to vector<8x8xf32>
    %cst_37 = arith.constant dense<0.000000e+00> : vector<8x8xf32>
    %107 = tpu.matmul %104, %105, %cst_37 {dimension_numbers = #tpu.dot_dimension_numbers<[1], [1], [0], [0], [0, 0, 1, 0], [], []>} : vector<8x8xf32>, vector<8x8xf32>, vector<8x8xf32> -> vector<8x8xf32>
    %cst_38 = arith.constant dense<0xFF800000> : vector<8xf32>
    %108 = vector.multi_reduction <maximumf>, %107, %cst_38 [1] : vector<8x8xf32> to vector<8xf32>
    %109 = vector.shape_cast %108 : vector<8xf32> to vector<8x1xf32>
    %110 = vector.broadcast %109 : vector<8x1xf32> to vector<8x8xf32>
    %111 = arith.subf %107, %110 : vector<8x8xf32>
    %112 = math.exp %111 : vector<8x8xf32>
    %cst_39 = arith.constant dense<0.000000e+00> : vector<8xf32>
    %113 = vector.multi_reduction <add>, %112, %cst_39 [1] : vector<8x8xf32> to vector<8xf32>
    %114 = vector.shape_cast %113 : vector<8xf32> to vector<8x1xf32>
    %115 = vector.broadcast %114 : vector<8x1xf32> to vector<8x8xf32>
    %116 = arith.divf %112, %115 : vector<8x8xf32>
    %cst_40 = arith.constant dense<0.000000e+00> : vector<8x8xf32>
    %117 = tpu.matmul %116, %106, %cst_40 {dimension_numbers = #tpu.dot_dimension_numbers<[1], [0], [0], [1], [0, 0, 1, 1], [], []>} : vector<8x8xf32>, vector<8x8xf32>, vector<8x8xf32> -> vector<8x8xf32>
    %118 = vector.extract_strided_slice %24 {offsets = [8, 16], sizes = [8, 8], strides = [1, 1]} : vector<16x32xf32> to vector<8x8xf32>
    %119 = vector.extract_strided_slice %28 {offsets = [8, 16], sizes = [8, 8], strides = [1, 1]} : vector<16x32xf32> to vector<8x8xf32>
    %120 = vector.extract_strided_slice %32 {offsets = [8, 16], sizes = [8, 8], strides = [1, 1]} : vector<16x32xf32> to vector<8x8xf32>
    %cst_41 = arith.constant dense<0.000000e+00> : vector<8x8xf32>
    %121 = tpu.matmul %118, %119, %cst_41 {dimension_numbers = #tpu.dot_dimension_numbers<[1], [1], [0], [0], [0, 0, 1, 0], [], []>} : vector<8x8xf32>, vector<8x8xf32>, vector<8x8xf32> -> vector<8x8xf32>
    %cst_42 = arith.constant dense<0xFF800000> : vector<8xf32>
    %122 = vector.multi_reduction <maximumf>, %121, %cst_42 [1] : vector<8x8xf32> to vector<8xf32>
    %123 = vector.shape_cast %122 : vector<8xf32> to vector<8x1xf32>
    %124 = vector.broadcast %123 : vector<8x1xf32> to vector<8x8xf32>
    %125 = arith.subf %121, %124 : vector<8x8xf32>
    %126 = math.exp %125 : vector<8x8xf32>
    %cst_43 = arith.constant dense<0.000000e+00> : vector<8xf32>
    %127 = vector.multi_reduction <add>, %126, %cst_43 [1] : vector<8x8xf32> to vector<8xf32>
    %128 = vector.shape_cast %127 : vector<8xf32> to vector<8x1xf32>
    %129 = vector.broadcast %128 : vector<8x1xf32> to vector<8x8xf32>
    %130 = arith.divf %126, %129 : vector<8x8xf32>
    %cst_44 = arith.constant dense<0.000000e+00> : vector<8x8xf32>
    %131 = tpu.matmul %130, %120, %cst_44 {dimension_numbers = #tpu.dot_dimension_numbers<[1], [0], [0], [1], [0, 0, 1, 1], [], []>} : vector<8x8xf32>, vector<8x8xf32>, vector<8x8xf32> -> vector<8x8xf32>
    %132 = vector.extract_strided_slice %24 {offsets = [8, 24], sizes = [8, 8], strides = [1, 1]} : vector<16x32xf32> to vector<8x8xf32>
    %133 = vector.extract_strided_slice %28 {offsets = [8, 24], sizes = [8, 8], strides = [1, 1]} : vector<16x32xf32> to vector<8x8xf32>
    %134 = vector.extract_strided_slice %32 {offsets = [8, 24], sizes = [8, 8], strides = [1, 1]} : vector<16x32xf32> to vector<8x8xf32>
    %cst_45 = arith.constant dense<0.000000e+00> : vector<8x8xf32>
    %135 = tpu.matmul %132, %133, %cst_45 {dimension_numbers = #tpu.dot_dimension_numbers<[1], [1], [0], [0], [0, 0, 1, 0], [], []>} : vector<8x8xf32>, vector<8x8xf32>, vector<8x8xf32> -> vector<8x8xf32>
    %cst_46 = arith.constant dense<0xFF800000> : vector<8xf32>
    %136 = vector.multi_reduction <maximumf>, %135, %cst_46 [1] : vector<8x8xf32> to vector<8xf32>
    %137 = vector.shape_cast %136 : vector<8xf32> to vector<8x1xf32>
    %138 = vector.broadcast %137 : vector<8x1xf32> to vector<8x8xf32>
    %139 = arith.subf %135, %138 : vector<8x8xf32>
    %140 = math.exp %139 : vector<8x8xf32>
    %cst_47 = arith.constant dense<0.000000e+00> : vector<8xf32>
    %141 = vector.multi_reduction <add>, %140, %cst_47 [1] : vector<8x8xf32> to vector<8xf32>
    %142 = vector.shape_cast %141 : vector<8xf32> to vector<8x1xf32>
    %143 = vector.broadcast %142 : vector<8x1xf32> to vector<8x8xf32>
    %144 = arith.divf %140, %143 : vector<8x8xf32>
    %cst_48 = arith.constant dense<0.000000e+00> : vector<8x8xf32>
    %145 = tpu.matmul %144, %134, %cst_48 {dimension_numbers = #tpu.dot_dimension_numbers<[1], [0], [0], [1], [0, 0, 1, 1], [], []>} : vector<8x8xf32>, vector<8x8xf32>, vector<8x8xf32> -> vector<8x8xf32>
    %146 = tpu.concatenate %103, %117, %131, %145 in 1 : vector<8x8xf32>, vector<8x8xf32>, vector<8x8xf32>, vector<8x8xf32> -> vector<8x32xf32>
    %147 = tpu.concatenate %89, %146 in 0 : vector<8x32xf32>, vector<8x32xf32> -> vector<16x32xf32>
    %cst_49 = arith.constant dense<0.000000e+00> : vector<16x32xf32>
    %148 = tpu.matmul %147, %13, %cst_49 {dimension_numbers = #tpu.dot_dimension_numbers<[1], [0], [0], [1], [0, 0, 1, 1], [], []>} : vector<16x32xf32>, vector<32x32xf32>, vector<16x32xf32> -> vector<16x32xf32>
    %149 = vector.extract_strided_slice %19 {offsets = [3, 0], sizes = [1, 32], strides = [1, 1]} : vector<10x32xf32> to vector<1x32xf32>
    %150 = vector.broadcast %149 : vector<1x32xf32> to vector<16x32xf32>
    %151 = arith.addf %148, %150 : vector<16x32xf32>
    %152 = arith.addf %151, %7 : vector<16x32xf32>
    %153 = vector.extract_strided_slice %19 {offsets = [4, 0], sizes = [1, 32], strides = [1, 1]} : vector<10x32xf32> to vector<1x32xf32>
    %154 = vector.extract_strided_slice %19 {offsets = [5, 0], sizes = [1, 32], strides = [1, 1]} : vector<10x32xf32> to vector<1x32xf32>
    %cst_50 = arith.constant dense<0.000000e+00> : vector<16xf32>
    %155 = vector.multi_reduction <add>, %152, %cst_50 [1] : vector<16x32xf32> to vector<16xf32>
    %156 = vector.shape_cast %155 : vector<16xf32> to vector<16x1xf32>
    %cst_51 = arith.constant 3.200000e+01 : f32
    %157 = vector.broadcast %cst_51 : f32 to vector<16x1xf32>
    %158 = arith.divf %156, %157 : vector<16x1xf32>
    %159 = vector.broadcast %158 : vector<16x1xf32> to vector<16x32xf32>
    %160 = arith.subf %152, %159 : vector<16x32xf32>
    %161 = arith.mulf %160, %160 : vector<16x32xf32>
    %cst_52 = arith.constant dense<0.000000e+00> : vector<16xf32>
    %162 = vector.multi_reduction <add>, %161, %cst_52 [1] : vector<16x32xf32> to vector<16xf32>
    %163 = vector.shape_cast %162 : vector<16xf32> to vector<16x1xf32>
    %cst_53 = arith.constant 3.200000e+01 : f32
    %164 = vector.broadcast %cst_53 : f32 to vector<16x1xf32>
    %165 = arith.divf %163, %164 : vector<16x1xf32>
    %166 = vector.broadcast %158 : vector<16x1xf32> to vector<16x32xf32>
    %167 = arith.subf %152, %166 : vector<16x32xf32>
    %cst_54 = arith.constant 9.99999996E-13 : f32
    %168 = vector.broadcast %cst_54 : f32 to vector<16x1xf32>
    %169 = arith.addf %165, %168 : vector<16x1xf32>
    %170 = math.rsqrt %169 : vector<16x1xf32>
    %171 = vector.broadcast %170 : vector<16x1xf32> to vector<16x32xf32>
    %172 = arith.mulf %167, %171 : vector<16x32xf32>
    %173 = vector.broadcast %153 : vector<1x32xf32> to vector<16x32xf32>
    %174 = arith.mulf %172, %173 : vector<16x32xf32>
    %175 = vector.broadcast %154 : vector<1x32xf32> to vector<16x32xf32>
    %176 = arith.addf %174, %175 : vector<16x32xf32>
    %cst_55 = arith.constant dense<0.000000e+00> : vector<16x32xf32>
    %177 = tpu.matmul %176, %15, %cst_55 {dimension_numbers = #tpu.dot_dimension_numbers<[1], [0], [0], [1], [0, 0, 1, 1], [], []>} : vector<16x32xf32>, vector<32x32xf32>, vector<16x32xf32> -> vector<16x32xf32>
    %178 = vector.extract_strided_slice %19 {offsets = [6, 0], sizes = [1, 32], strides = [1, 1]} : vector<10x32xf32> to vector<1x32xf32>
    %179 = vector.broadcast %178 : vector<1x32xf32> to vector<16x32xf32>
    %180 = arith.addf %177, %179 : vector<16x32xf32>
    %cst_56 = arith.constant 0.000000e+00 : f32
    %181 = vector.broadcast %cst_56 : f32 to vector<16x32xf32>
    %182 = arith.maximumf %180, %181 : vector<16x32xf32>
    %cst_57 = arith.constant dense<0.000000e+00> : vector<16x32xf32>
    %183 = tpu.matmul %182, %17, %cst_57 {dimension_numbers = #tpu.dot_dimension_numbers<[1], [0], [0], [1], [0, 0, 1, 1], [], []>} : vector<16x32xf32>, vector<32x32xf32>, vector<16x32xf32> -> vector<16x32xf32>
    %184 = vector.extract_strided_slice %19 {offsets = [7, 0], sizes = [1, 32], strides = [1, 1]} : vector<10x32xf32> to vector<1x32xf32>
    %185 = vector.broadcast %184 : vector<1x32xf32> to vector<16x32xf32>
    %186 = arith.addf %183, %185 : vector<16x32xf32>
    %187 = arith.addf %186, %176 : vector<16x32xf32>
    %188 = vector.extract_strided_slice %19 {offsets = [8, 0], sizes = [1, 32], strides = [1, 1]} : vector<10x32xf32> to vector<1x32xf32>
    %189 = vector.extract_strided_slice %19 {offsets = [9, 0], sizes = [1, 32], strides = [1, 1]} : vector<10x32xf32> to vector<1x32xf32>
    %cst_58 = arith.constant dense<0.000000e+00> : vector<16xf32>
    %190 = vector.multi_reduction <add>, %187, %cst_58 [1] : vector<16x32xf32> to vector<16xf32>
    %191 = vector.shape_cast %190 : vector<16xf32> to vector<16x1xf32>
    %cst_59 = arith.constant 3.200000e+01 : f32
    %192 = vector.broadcast %cst_59 : f32 to vector<16x1xf32>
    %193 = arith.divf %191, %192 : vector<16x1xf32>
    %194 = vector.broadcast %193 : vector<16x1xf32> to vector<16x32xf32>
    %195 = arith.subf %187, %194 : vector<16x32xf32>
    %196 = arith.mulf %195, %195 : vector<16x32xf32>
    %cst_60 = arith.constant dense<0.000000e+00> : vector<16xf32>
    %197 = vector.multi_reduction <add>, %196, %cst_60 [1] : vector<16x32xf32> to vector<16xf32>
    %198 = vector.shape_cast %197 : vector<16xf32> to vector<16x1xf32>
    %cst_61 = arith.constant 3.200000e+01 : f32
    %199 = vector.broadcast %cst_61 : f32 to vector<16x1xf32>
    %200 = arith.divf %198, %199 : vector<16x1xf32>
    %201 = vector.broadcast %193 : vector<16x1xf32> to vector<16x32xf32>
    %202 = arith.subf %187, %201 : vector<16x32xf32>
    %cst_62 = arith.constant 9.99999996E-13 : f32
    %203 = vector.broadcast %cst_62 : f32 to vector<16x1xf32>
    %204 = arith.addf %200, %203 : vector<16x1xf32>
    %205 = math.rsqrt %204 : vector<16x1xf32>
    %206 = vector.broadcast %205 : vector<16x1xf32> to vector<16x32xf32>
    %207 = arith.mulf %202, %206 : vector<16x32xf32>
    %208 = vector.broadcast %188 : vector<1x32xf32> to vector<16x32xf32>
    %209 = arith.mulf %207, %208 : vector<16x32xf32>
    %210 = vector.broadcast %189 : vector<1x32xf32> to vector<16x32xf32>
    %211 = arith.addf %209, %210 : vector<16x32xf32>
    %c1 = arith.constant 1 : index
    %c0_63 = arith.constant 0 : index
    %c0_64 = arith.constant 0 : index
    %212 = vector.load %arg3[%c1, %c0_63, %c0_64] : memref<2x32x96xf32, #tpu.memory_space<vmem>>, vector<1x32x96xf32>
    %213 = vector.shape_cast %212 : vector<1x32x96xf32> to vector<32x96xf32>
    %c1_65 = arith.constant 1 : index
    %c0_66 = arith.constant 0 : index
    %c0_67 = arith.constant 0 : index
    %c0_68 = arith.constant 0 : index
    %214 = vector.load %arg4[%c1_65, %c0_66, %c0_67, %c0_68] : memref<2x3x32x32xf32, #tpu.memory_space<vmem>>, vector<1x3x32x32xf32>
    %215 = vector.shape_cast %214 : vector<1x3x32x32xf32> to vector<3x32x32xf32>
    %216 = vector.extract_strided_slice %215 {offsets = [0, 0, 0], sizes = [1, 32, 32], strides = [1, 1, 1]} : vector<3x32x32xf32> to vector<1x32x32xf32>
    %217 = vector.shape_cast %216 : vector<1x32x32xf32> to vector<32x32xf32>
    %218 = vector.extract_strided_slice %215 {offsets = [1, 0, 0], sizes = [1, 32, 32], strides = [1, 1, 1]} : vector<3x32x32xf32> to vector<1x32x32xf32>
    %219 = vector.shape_cast %218 : vector<1x32x32xf32> to vector<32x32xf32>
    %220 = vector.extract_strided_slice %215 {offsets = [2, 0, 0], sizes = [1, 32, 32], strides = [1, 1, 1]} : vector<3x32x32xf32> to vector<1x32x32xf32>
    %221 = vector.shape_cast %220 : vector<1x32x32xf32> to vector<32x32xf32>
    %c1_69 = arith.constant 1 : index
    %c0_70 = arith.constant 0 : index
    %c0_71 = arith.constant 0 : index
    %222 = vector.load %arg5[%c1_69, %c0_70, %c0_71] : memref<2x10x32xf32, #tpu.memory_space<vmem>>, vector<1x10x32xf32>
    %223 = vector.shape_cast %222 : vector<1x10x32xf32> to vector<10x32xf32>
    %cst_72 = arith.constant dense<0.000000e+00> : vector<16x96xf32>
    %224 = tpu.matmul %211, %213, %cst_72 {dimension_numbers = #tpu.dot_dimension_numbers<[1], [0], [0], [1], [0, 0, 1, 1], [], []>} : vector<16x32xf32>, vector<32x96xf32>, vector<16x96xf32> -> vector<16x96xf32>
    %225 = vector.extract_strided_slice %224 {offsets = [0, 0], sizes = [16, 32], strides = [1, 1]} : vector<16x96xf32> to vector<16x32xf32>
    %226 = vector.extract_strided_slice %223 {offsets = [0, 0], sizes = [1, 32], strides = [1, 1]} : vector<10x32xf32> to vector<1x32xf32>
    %227 = vector.broadcast %226 : vector<1x32xf32> to vector<16x32xf32>
    %228 = arith.addf %225, %227 : vector<16x32xf32>
    %229 = vector.extract_strided_slice %224 {offsets = [0, 32], sizes = [16, 32], strides = [1, 1]} : vector<16x96xf32> to vector<16x32xf32>
    %230 = vector.extract_strided_slice %223 {offsets = [1, 0], sizes = [1, 32], strides = [1, 1]} : vector<10x32xf32> to vector<1x32xf32>
    %231 = vector.broadcast %230 : vector<1x32xf32> to vector<16x32xf32>
    %232 = arith.addf %229, %231 : vector<16x32xf32>
    %233 = vector.extract_strided_slice %224 {offsets = [0, 64], sizes = [16, 32], strides = [1, 1]} : vector<16x96xf32> to vector<16x32xf32>
    %234 = vector.extract_strided_slice %223 {offsets = [2, 0], sizes = [1, 32], strides = [1, 1]} : vector<10x32xf32> to vector<1x32xf32>
    %235 = vector.broadcast %234 : vector<1x32xf32> to vector<16x32xf32>
    %236 = arith.addf %233, %235 : vector<16x32xf32>
    %237 = vector.extract_strided_slice %228 {offsets = [0, 0], sizes = [8, 8], strides = [1, 1]} : vector<16x32xf32> to vector<8x8xf32>
    %238 = vector.extract_strided_slice %232 {offsets = [0, 0], sizes = [8, 8], strides = [1, 1]} : vector<16x32xf32> to vector<8x8xf32>
    %239 = vector.extract_strided_slice %236 {offsets = [0, 0], sizes = [8, 8], strides = [1, 1]} : vector<16x32xf32> to vector<8x8xf32>
    %cst_73 = arith.constant dense<0.000000e+00> : vector<8x8xf32>
    %240 = tpu.matmul %237, %238, %cst_73 {dimension_numbers = #tpu.dot_dimension_numbers<[1], [1], [0], [0], [0, 0, 1, 0], [], []>} : vector<8x8xf32>, vector<8x8xf32>, vector<8x8xf32> -> vector<8x8xf32>
    %cst_74 = arith.constant dense<0xFF800000> : vector<8xf32>
    %241 = vector.multi_reduction <maximumf>, %240, %cst_74 [1] : vector<8x8xf32> to vector<8xf32>
    %242 = vector.shape_cast %241 : vector<8xf32> to vector<8x1xf32>
    %243 = vector.broadcast %242 : vector<8x1xf32> to vector<8x8xf32>
    %244 = arith.subf %240, %243 : vector<8x8xf32>
    %245 = math.exp %244 : vector<8x8xf32>
    %cst_75 = arith.constant dense<0.000000e+00> : vector<8xf32>
    %246 = vector.multi_reduction <add>, %245, %cst_75 [1] : vector<8x8xf32> to vector<8xf32>
    %247 = vector.shape_cast %246 : vector<8xf32> to vector<8x1xf32>
    %248 = vector.broadcast %247 : vector<8x1xf32> to vector<8x8xf32>
    %249 = arith.divf %245, %248 : vector<8x8xf32>
    %cst_76 = arith.constant dense<0.000000e+00> : vector<8x8xf32>
    %250 = tpu.matmul %249, %239, %cst_76 {dimension_numbers = #tpu.dot_dimension_numbers<[1], [0], [0], [1], [0, 0, 1, 1], [], []>} : vector<8x8xf32>, vector<8x8xf32>, vector<8x8xf32> -> vector<8x8xf32>
    %251 = vector.extract_strided_slice %228 {offsets = [0, 8], sizes = [8, 8], strides = [1, 1]} : vector<16x32xf32> to vector<8x8xf32>
    %252 = vector.extract_strided_slice %232 {offsets = [0, 8], sizes = [8, 8], strides = [1, 1]} : vector<16x32xf32> to vector<8x8xf32>
    %253 = vector.extract_strided_slice %236 {offsets = [0, 8], sizes = [8, 8], strides = [1, 1]} : vector<16x32xf32> to vector<8x8xf32>
    %cst_77 = arith.constant dense<0.000000e+00> : vector<8x8xf32>
    %254 = tpu.matmul %251, %252, %cst_77 {dimension_numbers = #tpu.dot_dimension_numbers<[1], [1], [0], [0], [0, 0, 1, 0], [], []>} : vector<8x8xf32>, vector<8x8xf32>, vector<8x8xf32> -> vector<8x8xf32>
    %cst_78 = arith.constant dense<0xFF800000> : vector<8xf32>
    %255 = vector.multi_reduction <maximumf>, %254, %cst_78 [1] : vector<8x8xf32> to vector<8xf32>
    %256 = vector.shape_cast %255 : vector<8xf32> to vector<8x1xf32>
    %257 = vector.broadcast %256 : vector<8x1xf32> to vector<8x8xf32>
    %258 = arith.subf %254, %257 : vector<8x8xf32>
    %259 = math.exp %258 : vector<8x8xf32>
    %cst_79 = arith.constant dense<0.000000e+00> : vector<8xf32>
    %260 = vector.multi_reduction <add>, %259, %cst_79 [1] : vector<8x8xf32> to vector<8xf32>
    %261 = vector.shape_cast %260 : vector<8xf32> to vector<8x1xf32>
    %262 = vector.broadcast %261 : vector<8x1xf32> to vector<8x8xf32>
    %263 = arith.divf %259, %262 : vector<8x8xf32>
    %cst_80 = arith.constant dense<0.000000e+00> : vector<8x8xf32>
    %264 = tpu.matmul %263, %253, %cst_80 {dimension_numbers = #tpu.dot_dimension_numbers<[1], [0], [0], [1], [0, 0, 1, 1], [], []>} : vector<8x8xf32>, vector<8x8xf32>, vector<8x8xf32> -> vector<8x8xf32>
    %265 = vector.extract_strided_slice %228 {offsets = [0, 16], sizes = [8, 8], strides = [1, 1]} : vector<16x32xf32> to vector<8x8xf32>
    %266 = vector.extract_strided_slice %232 {offsets = [0, 16], sizes = [8, 8], strides = [1, 1]} : vector<16x32xf32> to vector<8x8xf32>
    %267 = vector.extract_strided_slice %236 {offsets = [0, 16], sizes = [8, 8], strides = [1, 1]} : vector<16x32xf32> to vector<8x8xf32>
    %cst_81 = arith.constant dense<0.000000e+00> : vector<8x8xf32>
    %268 = tpu.matmul %265, %266, %cst_81 {dimension_numbers = #tpu.dot_dimension_numbers<[1], [1], [0], [0], [0, 0, 1, 0], [], []>} : vector<8x8xf32>, vector<8x8xf32>, vector<8x8xf32> -> vector<8x8xf32>
    %cst_82 = arith.constant dense<0xFF800000> : vector<8xf32>
    %269 = vector.multi_reduction <maximumf>, %268, %cst_82 [1] : vector<8x8xf32> to vector<8xf32>
    %270 = vector.shape_cast %269 : vector<8xf32> to vector<8x1xf32>
    %271 = vector.broadcast %270 : vector<8x1xf32> to vector<8x8xf32>
    %272 = arith.subf %268, %271 : vector<8x8xf32>
    %273 = math.exp %272 : vector<8x8xf32>
    %cst_83 = arith.constant dense<0.000000e+00> : vector<8xf32>
    %274 = vector.multi_reduction <add>, %273, %cst_83 [1] : vector<8x8xf32> to vector<8xf32>
    %275 = vector.shape_cast %274 : vector<8xf32> to vector<8x1xf32>
    %276 = vector.broadcast %275 : vector<8x1xf32> to vector<8x8xf32>
    %277 = arith.divf %273, %276 : vector<8x8xf32>
    %cst_84 = arith.constant dense<0.000000e+00> : vector<8x8xf32>
    %278 = tpu.matmul %277, %267, %cst_84 {dimension_numbers = #tpu.dot_dimension_numbers<[1], [0], [0], [1], [0, 0, 1, 1], [], []>} : vector<8x8xf32>, vector<8x8xf32>, vector<8x8xf32> -> vector<8x8xf32>
    %279 = vector.extract_strided_slice %228 {offsets = [0, 24], sizes = [8, 8], strides = [1, 1]} : vector<16x32xf32> to vector<8x8xf32>
    %280 = vector.extract_strided_slice %232 {offsets = [0, 24], sizes = [8, 8], strides = [1, 1]} : vector<16x32xf32> to vector<8x8xf32>
    %281 = vector.extract_strided_slice %236 {offsets = [0, 24], sizes = [8, 8], strides = [1, 1]} : vector<16x32xf32> to vector<8x8xf32>
    %cst_85 = arith.constant dense<0.000000e+00> : vector<8x8xf32>
    %282 = tpu.matmul %279, %280, %cst_85 {dimension_numbers = #tpu.dot_dimension_numbers<[1], [1], [0], [0], [0, 0, 1, 0], [], []>} : vector<8x8xf32>, vector<8x8xf32>, vector<8x8xf32> -> vector<8x8xf32>
    %cst_86 = arith.constant dense<0xFF800000> : vector<8xf32>
    %283 = vector.multi_reduction <maximumf>, %282, %cst_86 [1] : vector<8x8xf32> to vector<8xf32>
    %284 = vector.shape_cast %283 : vector<8xf32> to vector<8x1xf32>
    %285 = vector.broadcast %284 : vector<8x1xf32> to vector<8x8xf32>
    %286 = arith.subf %282, %285 : vector<8x8xf32>
    %287 = math.exp %286 : vector<8x8xf32>
    %cst_87 = arith.constant dense<0.000000e+00> : vector<8xf32>
    %288 = vector.multi_reduction <add>, %287, %cst_87 [1] : vector<8x8xf32> to vector<8xf32>
    %289 = vector.shape_cast %288 : vector<8xf32> to vector<8x1xf32>
    %290 = vector.broadcast %289 : vector<8x1xf32> to vector<8x8xf32>
    %291 = arith.divf %287, %290 : vector<8x8xf32>
    %cst_88 = arith.constant dense<0.000000e+00> : vector<8x8xf32>
    %292 = tpu.matmul %291, %281, %cst_88 {dimension_numbers = #tpu.dot_dimension_numbers<[1], [0], [0], [1], [0, 0, 1, 1], [], []>} : vector<8x8xf32>, vector<8x8xf32>, vector<8x8xf32> -> vector<8x8xf32>
    %293 = tpu.concatenate %250, %264, %278, %292 in 1 : vector<8x8xf32>, vector<8x8xf32>, vector<8x8xf32>, vector<8x8xf32> -> vector<8x32xf32>
    %294 = vector.extract_strided_slice %228 {offsets = [8, 0], sizes = [8, 8], strides = [1, 1]} : vector<16x32xf32> to vector<8x8xf32>
    %295 = vector.extract_strided_slice %232 {offsets = [8, 0], sizes = [8, 8], strides = [1, 1]} : vector<16x32xf32> to vector<8x8xf32>
    %296 = vector.extract_strided_slice %236 {offsets = [8, 0], sizes = [8, 8], strides = [1, 1]} : vector<16x32xf32> to vector<8x8xf32>
    %cst_89 = arith.constant dense<0.000000e+00> : vector<8x8xf32>
    %297 = tpu.matmul %294, %295, %cst_89 {dimension_numbers = #tpu.dot_dimension_numbers<[1], [1], [0], [0], [0, 0, 1, 0], [], []>} : vector<8x8xf32>, vector<8x8xf32>, vector<8x8xf32> -> vector<8x8xf32>
    %cst_90 = arith.constant dense<0xFF800000> : vector<8xf32>
    %298 = vector.multi_reduction <maximumf>, %297, %cst_90 [1] : vector<8x8xf32> to vector<8xf32>
    %299 = vector.shape_cast %298 : vector<8xf32> to vector<8x1xf32>
    %300 = vector.broadcast %299 : vector<8x1xf32> to vector<8x8xf32>
    %301 = arith.subf %297, %300 : vector<8x8xf32>
    %302 = math.exp %301 : vector<8x8xf32>
    %cst_91 = arith.constant dense<0.000000e+00> : vector<8xf32>
    %303 = vector.multi_reduction <add>, %302, %cst_91 [1] : vector<8x8xf32> to vector<8xf32>
    %304 = vector.shape_cast %303 : vector<8xf32> to vector<8x1xf32>
    %305 = vector.broadcast %304 : vector<8x1xf32> to vector<8x8xf32>
    %306 = arith.divf %302, %305 : vector<8x8xf32>
    %cst_92 = arith.constant dense<0.000000e+00> : vector<8x8xf32>
    %307 = tpu.matmul %306, %296, %cst_92 {dimension_numbers = #tpu.dot_dimension_numbers<[1], [0], [0], [1], [0, 0, 1, 1], [], []>} : vector<8x8xf32>, vector<8x8xf32>, vector<8x8xf32> -> vector<8x8xf32>
    %308 = vector.extract_strided_slice %228 {offsets = [8, 8], sizes = [8, 8], strides = [1, 1]} : vector<16x32xf32> to vector<8x8xf32>
    %309 = vector.extract_strided_slice %232 {offsets = [8, 8], sizes = [8, 8], strides = [1, 1]} : vector<16x32xf32> to vector<8x8xf32>
    %310 = vector.extract_strided_slice %236 {offsets = [8, 8], sizes = [8, 8], strides = [1, 1]} : vector<16x32xf32> to vector<8x8xf32>
    %cst_93 = arith.constant dense<0.000000e+00> : vector<8x8xf32>
    %311 = tpu.matmul %308, %309, %cst_93 {dimension_numbers = #tpu.dot_dimension_numbers<[1], [1], [0], [0], [0, 0, 1, 0], [], []>} : vector<8x8xf32>, vector<8x8xf32>, vector<8x8xf32> -> vector<8x8xf32>
    %cst_94 = arith.constant dense<0xFF800000> : vector<8xf32>
    %312 = vector.multi_reduction <maximumf>, %311, %cst_94 [1] : vector<8x8xf32> to vector<8xf32>
    %313 = vector.shape_cast %312 : vector<8xf32> to vector<8x1xf32>
    %314 = vector.broadcast %313 : vector<8x1xf32> to vector<8x8xf32>
    %315 = arith.subf %311, %314 : vector<8x8xf32>
    %316 = math.exp %315 : vector<8x8xf32>
    %cst_95 = arith.constant dense<0.000000e+00> : vector<8xf32>
    %317 = vector.multi_reduction <add>, %316, %cst_95 [1] : vector<8x8xf32> to vector<8xf32>
    %318 = vector.shape_cast %317 : vector<8xf32> to vector<8x1xf32>
    %319 = vector.broadcast %318 : vector<8x1xf32> to vector<8x8xf32>
    %320 = arith.divf %316, %319 : vector<8x8xf32>
    %cst_96 = arith.constant dense<0.000000e+00> : vector<8x8xf32>
    %321 = tpu.matmul %320, %310, %cst_96 {dimension_numbers = #tpu.dot_dimension_numbers<[1], [0], [0], [1], [0, 0, 1, 1], [], []>} : vector<8x8xf32>, vector<8x8xf32>, vector<8x8xf32> -> vector<8x8xf32>
    %322 = vector.extract_strided_slice %228 {offsets = [8, 16], sizes = [8, 8], strides = [1, 1]} : vector<16x32xf32> to vector<8x8xf32>
    %323 = vector.extract_strided_slice %232 {offsets = [8, 16], sizes = [8, 8], strides = [1, 1]} : vector<16x32xf32> to vector<8x8xf32>
    %324 = vector.extract_strided_slice %236 {offsets = [8, 16], sizes = [8, 8], strides = [1, 1]} : vector<16x32xf32> to vector<8x8xf32>
    %cst_97 = arith.constant dense<0.000000e+00> : vector<8x8xf32>
    %325 = tpu.matmul %322, %323, %cst_97 {dimension_numbers = #tpu.dot_dimension_numbers<[1], [1], [0], [0], [0, 0, 1, 0], [], []>} : vector<8x8xf32>, vector<8x8xf32>, vector<8x8xf32> -> vector<8x8xf32>
    %cst_98 = arith.constant dense<0xFF800000> : vector<8xf32>
    %326 = vector.multi_reduction <maximumf>, %325, %cst_98 [1] : vector<8x8xf32> to vector<8xf32>
    %327 = vector.shape_cast %326 : vector<8xf32> to vector<8x1xf32>
    %328 = vector.broadcast %327 : vector<8x1xf32> to vector<8x8xf32>
    %329 = arith.subf %325, %328 : vector<8x8xf32>
    %330 = math.exp %329 : vector<8x8xf32>
    %cst_99 = arith.constant dense<0.000000e+00> : vector<8xf32>
    %331 = vector.multi_reduction <add>, %330, %cst_99 [1] : vector<8x8xf32> to vector<8xf32>
    %332 = vector.shape_cast %331 : vector<8xf32> to vector<8x1xf32>
    %333 = vector.broadcast %332 : vector<8x1xf32> to vector<8x8xf32>
    %334 = arith.divf %330, %333 : vector<8x8xf32>
    %cst_100 = arith.constant dense<0.000000e+00> : vector<8x8xf32>
    %335 = tpu.matmul %334, %324, %cst_100 {dimension_numbers = #tpu.dot_dimension_numbers<[1], [0], [0], [1], [0, 0, 1, 1], [], []>} : vector<8x8xf32>, vector<8x8xf32>, vector<8x8xf32> -> vector<8x8xf32>
    %336 = vector.extract_strided_slice %228 {offsets = [8, 24], sizes = [8, 8], strides = [1, 1]} : vector<16x32xf32> to vector<8x8xf32>
    %337 = vector.extract_strided_slice %232 {offsets = [8, 24], sizes = [8, 8], strides = [1, 1]} : vector<16x32xf32> to vector<8x8xf32>
    %338 = vector.extract_strided_slice %236 {offsets = [8, 24], sizes = [8, 8], strides = [1, 1]} : vector<16x32xf32> to vector<8x8xf32>
    %cst_101 = arith.constant dense<0.000000e+00> : vector<8x8xf32>
    %339 = tpu.matmul %336, %337, %cst_101 {dimension_numbers = #tpu.dot_dimension_numbers<[1], [1], [0], [0], [0, 0, 1, 0], [], []>} : vector<8x8xf32>, vector<8x8xf32>, vector<8x8xf32> -> vector<8x8xf32>
    %cst_102 = arith.constant dense<0xFF800000> : vector<8xf32>
    %340 = vector.multi_reduction <maximumf>, %339, %cst_102 [1] : vector<8x8xf32> to vector<8xf32>
    %341 = vector.shape_cast %340 : vector<8xf32> to vector<8x1xf32>
    %342 = vector.broadcast %341 : vector<8x1xf32> to vector<8x8xf32>
    %343 = arith.subf %339, %342 : vector<8x8xf32>
    %344 = math.exp %343 : vector<8x8xf32>
    %cst_103 = arith.constant dense<0.000000e+00> : vector<8xf32>
    %345 = vector.multi_reduction <add>, %344, %cst_103 [1] : vector<8x8xf32> to vector<8xf32>
    %346 = vector.shape_cast %345 : vector<8xf32> to vector<8x1xf32>
    %347 = vector.broadcast %346 : vector<8x1xf32> to vector<8x8xf32>
    %348 = arith.divf %344, %347 : vector<8x8xf32>
    %cst_104 = arith.constant dense<0.000000e+00> : vector<8x8xf32>
    %349 = tpu.matmul %348, %338, %cst_104 {dimension_numbers = #tpu.dot_dimension_numbers<[1], [0], [0], [1], [0, 0, 1, 1], [], []>} : vector<8x8xf32>, vector<8x8xf32>, vector<8x8xf32> -> vector<8x8xf32>
    %350 = tpu.concatenate %307, %321, %335, %349 in 1 : vector<8x8xf32>, vector<8x8xf32>, vector<8x8xf32>, vector<8x8xf32> -> vector<8x32xf32>
    %351 = tpu.concatenate %293, %350 in 0 : vector<8x32xf32>, vector<8x32xf32> -> vector<16x32xf32>
    %cst_105 = arith.constant dense<0.000000e+00> : vector<16x32xf32>
    %352 = tpu.matmul %351, %217, %cst_105 {dimension_numbers = #tpu.dot_dimension_numbers<[1], [0], [0], [1], [0, 0, 1, 1], [], []>} : vector<16x32xf32>, vector<32x32xf32>, vector<16x32xf32> -> vector<16x32xf32>
    %353 = vector.extract_strided_slice %223 {offsets = [3, 0], sizes = [1, 32], strides = [1, 1]} : vector<10x32xf32> to vector<1x32xf32>
    %354 = vector.broadcast %353 : vector<1x32xf32> to vector<16x32xf32>
    %355 = arith.addf %352, %354 : vector<16x32xf32>
    %356 = arith.addf %355, %211 : vector<16x32xf32>
    %357 = vector.extract_strided_slice %223 {offsets = [4, 0], sizes = [1, 32], strides = [1, 1]} : vector<10x32xf32> to vector<1x32xf32>
    %358 = vector.extract_strided_slice %223 {offsets = [5, 0], sizes = [1, 32], strides = [1, 1]} : vector<10x32xf32> to vector<1x32xf32>
    %cst_106 = arith.constant dense<0.000000e+00> : vector<16xf32>
    %359 = vector.multi_reduction <add>, %356, %cst_106 [1] : vector<16x32xf32> to vector<16xf32>
    %360 = vector.shape_cast %359 : vector<16xf32> to vector<16x1xf32>
    %cst_107 = arith.constant 3.200000e+01 : f32
    %361 = vector.broadcast %cst_107 : f32 to vector<16x1xf32>
    %362 = arith.divf %360, %361 : vector<16x1xf32>
    %363 = vector.broadcast %362 : vector<16x1xf32> to vector<16x32xf32>
    %364 = arith.subf %356, %363 : vector<16x32xf32>
    %365 = arith.mulf %364, %364 : vector<16x32xf32>
    %cst_108 = arith.constant dense<0.000000e+00> : vector<16xf32>
    %366 = vector.multi_reduction <add>, %365, %cst_108 [1] : vector<16x32xf32> to vector<16xf32>
    %367 = vector.shape_cast %366 : vector<16xf32> to vector<16x1xf32>
    %cst_109 = arith.constant 3.200000e+01 : f32
    %368 = vector.broadcast %cst_109 : f32 to vector<16x1xf32>
    %369 = arith.divf %367, %368 : vector<16x1xf32>
    %370 = vector.broadcast %362 : vector<16x1xf32> to vector<16x32xf32>
    %371 = arith.subf %356, %370 : vector<16x32xf32>
    %cst_110 = arith.constant 9.99999996E-13 : f32
    %372 = vector.broadcast %cst_110 : f32 to vector<16x1xf32>
    %373 = arith.addf %369, %372 : vector<16x1xf32>
    %374 = math.rsqrt %373 : vector<16x1xf32>
    %375 = vector.broadcast %374 : vector<16x1xf32> to vector<16x32xf32>
    %376 = arith.mulf %371, %375 : vector<16x32xf32>
    %377 = vector.broadcast %357 : vector<1x32xf32> to vector<16x32xf32>
    %378 = arith.mulf %376, %377 : vector<16x32xf32>
    %379 = vector.broadcast %358 : vector<1x32xf32> to vector<16x32xf32>
    %380 = arith.addf %378, %379 : vector<16x32xf32>
    %cst_111 = arith.constant dense<0.000000e+00> : vector<16x32xf32>
    %381 = tpu.matmul %380, %219, %cst_111 {dimension_numbers = #tpu.dot_dimension_numbers<[1], [0], [0], [1], [0, 0, 1, 1], [], []>} : vector<16x32xf32>, vector<32x32xf32>, vector<16x32xf32> -> vector<16x32xf32>
    %382 = vector.extract_strided_slice %223 {offsets = [6, 0], sizes = [1, 32], strides = [1, 1]} : vector<10x32xf32> to vector<1x32xf32>
    %383 = vector.broadcast %382 : vector<1x32xf32> to vector<16x32xf32>
    %384 = arith.addf %381, %383 : vector<16x32xf32>
    %cst_112 = arith.constant 0.000000e+00 : f32
    %385 = vector.broadcast %cst_112 : f32 to vector<16x32xf32>
    %386 = arith.maximumf %384, %385 : vector<16x32xf32>
    %cst_113 = arith.constant dense<0.000000e+00> : vector<16x32xf32>
    %387 = tpu.matmul %386, %221, %cst_113 {dimension_numbers = #tpu.dot_dimension_numbers<[1], [0], [0], [1], [0, 0, 1, 1], [], []>} : vector<16x32xf32>, vector<32x32xf32>, vector<16x32xf32> -> vector<16x32xf32>
    %388 = vector.extract_strided_slice %223 {offsets = [7, 0], sizes = [1, 32], strides = [1, 1]} : vector<10x32xf32> to vector<1x32xf32>
    %389 = vector.broadcast %388 : vector<1x32xf32> to vector<16x32xf32>
    %390 = arith.addf %387, %389 : vector<16x32xf32>
    %391 = arith.addf %390, %380 : vector<16x32xf32>
    %392 = vector.extract_strided_slice %223 {offsets = [8, 0], sizes = [1, 32], strides = [1, 1]} : vector<10x32xf32> to vector<1x32xf32>
    %393 = vector.extract_strided_slice %223 {offsets = [9, 0], sizes = [1, 32], strides = [1, 1]} : vector<10x32xf32> to vector<1x32xf32>
    %cst_114 = arith.constant dense<0.000000e+00> : vector<16xf32>
    %394 = vector.multi_reduction <add>, %391, %cst_114 [1] : vector<16x32xf32> to vector<16xf32>
    %395 = vector.shape_cast %394 : vector<16xf32> to vector<16x1xf32>
    %cst_115 = arith.constant 3.200000e+01 : f32
    %396 = vector.broadcast %cst_115 : f32 to vector<16x1xf32>
    %397 = arith.divf %395, %396 : vector<16x1xf32>
    %398 = vector.broadcast %397 : vector<16x1xf32> to vector<16x32xf32>
    %399 = arith.subf %391, %398 : vector<16x32xf32>
    %400 = arith.mulf %399, %399 : vector<16x32xf32>
    %cst_116 = arith.constant dense<0.000000e+00> : vector<16xf32>
    %401 = vector.multi_reduction <add>, %400, %cst_116 [1] : vector<16x32xf32> to vector<16xf32>
    %402 = vector.shape_cast %401 : vector<16xf32> to vector<16x1xf32>
    %cst_117 = arith.constant 3.200000e+01 : f32
    %403 = vector.broadcast %cst_117 : f32 to vector<16x1xf32>
    %404 = arith.divf %402, %403 : vector<16x1xf32>
    %405 = vector.broadcast %397 : vector<16x1xf32> to vector<16x32xf32>
    %406 = arith.subf %391, %405 : vector<16x32xf32>
    %cst_118 = arith.constant 9.99999996E-13 : f32
    %407 = vector.broadcast %cst_118 : f32 to vector<16x1xf32>
    %408 = arith.addf %404, %407 : vector<16x1xf32>
    %409 = math.rsqrt %408 : vector<16x1xf32>
    %410 = vector.broadcast %409 : vector<16x1xf32> to vector<16x32xf32>
    %411 = arith.mulf %406, %410 : vector<16x32xf32>
    %412 = vector.broadcast %392 : vector<1x32xf32> to vector<16x32xf32>
    %413 = arith.mulf %411, %412 : vector<16x32xf32>
    %414 = vector.broadcast %393 : vector<1x32xf32> to vector<16x32xf32>
    %415 = arith.addf %413, %414 : vector<16x32xf32>
    %416 = vector.extract_strided_slice %415 {offsets = [7, 0], sizes = [1, 32], strides = [1, 1]} : vector<16x32xf32> to vector<1x32xf32>
    %417 = vector.extract_strided_slice %415 {offsets = [15, 0], sizes = [1, 32], strides = [1, 1]} : vector<16x32xf32> to vector<1x32xf32>
    %418 = tpu.concatenate %416, %417 in 0 : vector<1x32xf32>, vector<1x32xf32> -> vector<2x32xf32>
    %c0_119 = arith.constant 0 : index
    %c0_120 = arith.constant 0 : index
    %419 = vector.load %arg6[%c0_119, %c0_120] : memref<32x3xf32, #tpu.memory_space<vmem>>, vector<32x3xf32>
    %cst_121 = arith.constant dense<0.000000e+00> : vector<2x3xf32>
    %420 = tpu.matmul %418, %419, %cst_121 {dimension_numbers = #tpu.dot_dimension_numbers<[1], [0], [0], [1], [0, 0, 1, 1], [], []>} : vector<2x32xf32>, vector<32x3xf32>, vector<2x3xf32> -> vector<2x3xf32>
    %c0_122 = arith.constant 0 : index
    %c0_123 = arith.constant 0 : index
    %421 = vector.load %arg7[%c0_122, %c0_123] : memref<1x3xf32, #tpu.memory_space<vmem>>, vector<1x3xf32>
    %422 = vector.broadcast %421 : vector<1x3xf32> to vector<2x3xf32>
    %423 = arith.addf %420, %422 : vector<2x3xf32>
    %c0_124 = arith.constant 0 : index
    %c0_125 = arith.constant 0 : index
    %424 = vector.load %arg8[%c0_124, %c0_125] : memref<2x3xf32, #tpu.memory_space<vmem>>, vector<2x3xf32>
    tpu.vector_store %arg8[%c0_124, %c0_125], %423 {strides = array<i32>} : memref<2x3xf32, #tpu.memory_space<vmem>>, vector<2x3xf32>,
    return
  }
}

</mosaic_0001>

<bundles_post_ra>
// kernel: transformer_forward.1
= control target key start
LH: loop header
LB: loop body
LE: loop exit
PB: predicated region body
PF: predicated region fallthrough
CT: control target
= control target key end

     0   :  { %13 = vsyncpa [#allocation3], 0  ;;  %s5053_s0 = inlined_call_operand.vmem [shape: f32[16,4], index: 0, kind: input, shape index: {}]   ;;  %s5054_s1 = inlined_call_operand.vmem [shape: f32[4,32], index: 1, kind: input, shape index: {}]   ;;  %s5055_s2 = inlined_call_operand.vmem [shape: f32[1,32], index: 2, kind: input, shape index: {}]   ;;  %s5056_s3 = inlined_call_operand.vmem [shape: f32[2,32,96], index: 3, kind: input, shape index: {}]   ;;  %s5057_s4 = inlined_call_operand.hbm [shape: f32[2,3,32,32], index: 4, kind: input, shape index: {}]   ;;  %s5058_s5 = inlined_call_operand.vmem [shape: f32[2,10,32], index: 5, kind: input, shape index: {}]   ;;  %s5059_s6 = inlined_call_operand.vmem [shape: f32[32,3], index: 6, kind: input, shape index: {}]   ;;  %s5060_s7 = inlined_call_operand.vmem [shape: f32[1,3], index: 7, kind: input, shape index: {}]   ;;  %s5061_s8 = inlined_call_operand.hbm [shape: f32[2,3], index: 8, kind: output, shape index: {}]  }
   0x1   :  { %14 = vsyncpa [#allocation4], 0  ;;  %s4491_s27 = smov [#allocation2]  }
   0x2   :  { %s28_s28 = sshll.u32 %s4491_s27, 4  ;;  %s29_s28 = int_to_ptr.vmem [resolvable:$true] %s28_s28 }
   0x3   :  { %s4455_s29 = scalar_lea.vmem %s29_s28, 3072  ;;  %p4460_p1 = scmp.lt.s32.totalorder %s29_s28, %s29_s28 }
   0x4   :  { %p4456_p0 = scmp.ne.s32.totalorder %s29_s28, %s4455_s29  ;;  %p4461_p2 = scmp.lt.s32.totalorder %s4455_s29, %s4455_s29 }
   0x6   :  { %p4462_p3 = por %p4461_p2, %p4460_p1 }
   0x8   :  { %p4463_p4 = pnand %p4462_p3, %p4456_p0 }
   0xa   :  { %4466 = shalt.err (!%p4463_p4)
}
   0xb   :  { %s4492_s30 = smov 128   ;;  %s4493_s9 = smov 8  }
   0xc   :  { %34 = dma.hbm_to_vmem [thread:$0]  %s5057_s4, 3072, %s29_s28, [#allocation3], %s4492_s30, %s4492_s30, %s4493_s9  }
   0xd   :  { %4487 = dma.done.wait [#allocation3], 3072  }
   0xe   :  { %4488 = vsyncadd [#allocation3], 4294964224  ;;  %vm61_vm0 = vcmask 1043456   ;;  %vm54_vm1 = vcmask 31744   ;;  %v46_v0 = vld [vmem:[%s5054_s1] sm:$0xf]  ;;  %v242_v7 = vlaneseq }
   0xf   :  { %v44_v1 = vld [vmem:[%s5053_s0] sm:$0xff]  ;;  %v45_v2 = vld [vmem:[%s5053_s0 + $0x8] sm:$0xff]  ;;  %4083 = vmatprep.subr.msk.mxu0 %vm61_vm0, %v46_v0  ;;  %v145_v3 = vld [vmem:[%s5056_s3 + $0x18] sm:$0xff]  ;;  %s4494_s25 = smov 32   ;;  %vm160_vm2 = vcmask 261120   ;;  %v4495_v19 = vmov 0.0  }
  0x10   :  { %4085 = vmatprep.mubr.msk.f32.mxu0 %vm54_vm1, %v44_v1  ;;  %4084 = vmatpush3.msk.msra.mxu0 %vm61_vm0, %v46_v0  ;;  %v144_v4 = vld [vmem:[%s5056_s3 + $0x10] sm:$0xff]  ;;  %v143_v5 = vld [vmem:[%s5056_s3 + $0x8] sm:$0xff]  ;;  %v142_v6 = vld [vmem:[%s5056_s3] sm:$0xff]  ;;  %v4581_v8 = vshrl.u32 %v242_v7, 7  ;;  %vm4496_vm3 = vmmov 0   ;;  %s4498_s28 = smov 96  }
  0x11   :  { %4086 = vmatmul.mubr.msk.f32.vlgmr.msra.gmra.mxu0 %vm54_vm1, %v45_v2  ;;  %4088 = vmatprep.subr.mxu1 %v145_v3  ;;  %v4586_v9 = vld [vmem:[%s5058_s5] sm:$0xff]  ;;  %s4499_s29 = smov 80   ;;  %s4500_s30 = smov 120   ;;  %vm271_vm4 = vcmask 64512   ;;  %vm943_vm5 = vcmask 130048   ;;  %vm945_vm6 = vcmask 195584  }
  0x12   :  { %4089 = vmatpush3.msra.mxu1 %v145_v3  ;;  %v4589_v10 = vsub.s32 1, %v4581_v8  ;;  %v3887_v12 = vld [vmem:[%s5055_s2] ss:$0 sm:$0xff]  ;;  %4099 = vmatprep.subr.mxu0 %v4495_v19  ;;  %v4614_v21 = vsub.s32 0, %v4581_v8  ;;  %s4497_s2 = smov 88   ;;  %s4501_s10 = smov 72  }
  0x13   :  { %4090 = vmatprep.subr.mxu1 %v144_v4  ;;  %4101 = vmatprep.mubr.msk.f32.mxu0 %vm4496_vm3, %v4495_v19  ;;  %s4502_s11 = smov 112   ;;  %s4503_s12 = smov 104   ;;  %v260_v3 = vsub.s32 2, %v4581_v8  ;;  %vm3784_vm7 = vcmask 1040384   ;;  %vm3870_vm8 = vcmask 17408  }
  0x14   :  { %4091 = vmatpush3.msra.mxu1 %v144_v4  ;;  %v251_v11 = vrot.slane %v4586_v9, %v4589_v10  ;;  %v245_v25 = vrot.slane %v4586_v9, %v4614_v21  ;;  %s4504_s13 = smov 64   ;;  %s4505_s14 = smov 56  }
  0x15   :  { %4092 = vmatprep.subr.mxu1 %v143_v5  ;;  %v261_v4 = vrot.slane %v4586_v9, %v260_v3  ;;  %s4506_s15 = smov 48   ;;  %s4507_s16 = smov 40  }
  0x16   :  { %4093 = vmatpush3.msra.mxu1 %v143_v5  ;;  %253 = vrot.lane.b32.xlu0 %v251_v11, %s4494_s25  ;;  %s4508_s17 = smov 16   ;;  %s4509_s4 = smov 24  }
  0x17   :  { %4094 = vmatprep.subr.mxu1 %v142_v6 }
  0x18   :  { %4095 = vmatpush3.msra.mxu1 %v142_v6 }
  0x19   :  { %4109 = vmatprep.subr.mxu1 %v4495_v19 }
  0x88   :  { %v254_v22 = vpop.permute.xlu0 %253 }
  0xd1   :  { %v4087_v13 = vpop.f32.mrf.mxu0 }
  0xd2   :  { %v137_v14 = vadd.f32 %v4087_v13, %v3887_v12 }
  0xd3   :  { %v131_v15 = vpop.f32.mrf.mxu0 }
  0xd4   :  { %v132_v16 = vadd.f32 %v3887_v12, %v131_v15  ;;  %v4599_v18 = vmul.f32 5.656854, %v137_v14 }
  0xd6   :  { %v4597_v17 = vmul.f32 5.656854, %v132_v16 }
  0xd8   :  { %4096 = vmatprep.mubr.msk.f32.mxu1 %vm160_vm2, %v4597_v17 }
  0xd9   :  { %4097 = vmatmul.mubr.msk.f32.vlgmr.msra.gmra.mxu1 %vm160_vm2, %v4599_v18 }
  0xda   :  { %4111 = vmatprep.mubr.msk.f32.mxu1 %vm4496_vm3, %v4495_v19 }
 0x199   :  { %v4611_v20 = vpop.f32.mrf.mxu1 }
 0x19a   :  { %v257_v27 = vadd.f32 %v4611_v20, %v254_v22  ;;  %v247_v28 = vadd.f32 %v4611_v20, %v245_v25 }
 0x19b   :  { %v4616_v23 = vpop.f32.mrf.mxu1 }
 0x19c   :  { %v256_v24 = vadd.f32 %v254_v22, %v4616_v23  ;;  %v246_v26 = vadd.f32 %v245_v25, %v4616_v23 }
 0x19e   :  { %437 = vrot.lane.b32.xlu1 %v256_v24, %s4497_s2  ;;  %269 = vrot.lane.b32.xlu0 %v256_v24, %s4498_s28 }
 0x1a2   :  { %602 = vrot.lane.b32.xlu0 %v256_v24, %s4499_s29  ;;  %435 = vrot.lane.b32.xlu1 %v246_v26, %s4500_s30 }
 0x1a6   :  { %767 = vrot.lane.b32.xlu0 %v256_v24, %s4501_s10  ;;  %600 = vrot.lane.b32.xlu1 %v246_v26, %s4502_s11 }
 0x1aa   :  { %948 = vrot.lane.b32.xlu0 %v257_v27, %s4498_s28  ;;  %765 = vrot.lane.b32.xlu1 %v246_v26, %s4503_s12 }
 0x1ae   :  { %1113 = vrot.lane.b32.xlu0 %v247_v28, %s4500_s30  ;;  %1115 = vrot.lane.b32.xlu1 %v257_v27, %s4497_s2 }
 0x1b2   :  { %1278 = vrot.lane.b32.xlu0 %v247_v28, %s4502_s11  ;;  %1280 = vrot.lane.b32.xlu1 %v257_v27, %s4499_s29 }
 0x1b6   :  { %1443 = vrot.lane.b32.xlu0 %v247_v28, %s4503_s12  ;;  %1445 = vrot.lane.b32.xlu1 %v257_v27, %s4501_s10 }
 0x210   :  { %v438_v29 = vpop.permute.xlu1 %437  ;;  %v270_v30 = vpop.permute.xlu0 %269 }
 0x211   :  { %4100 = vmatpush3.xpose.msk.msra.mxu0 %vm271_vm4, %v270_v30  ;;  %4110 = vmatpush3.xpose.msk.msra.mxu1 %vm271_vm4, %v438_v29 }
 0x212   :  { %4119 = vmatprep.subr.mxu1 %v4495_v19  ;;  %4104 = vmatprep.subr.mxu0 %v4495_v19 }
 0x214   :  { %v603_v31 = vpop.permute.xlu0 %602  ;;  %v436_v32 = vpop.permute.xlu1 %435  ;;  %4102 = vmatmul.mubr.msk.f32.vlgmr.msra.gmra.mxu0 %vm271_vm4, %v246_v26 }
 0x215   :  { %4112 = vmatmul.mubr.msk.f32.vlgmr.msra.gmra.mxu1 %vm271_vm4, %v436_v32  ;;  %4106 = vmatprep.mubr.msk.f32.mxu0 %vm4496_vm3, %v4495_v19 }
 0x216   :  { %4120 = vmatpush3.xpose.msk.msra.mxu1 %vm271_vm4, %v603_v31  ;;  %4121 = vmatprep.mubr.msk.f32.mxu1 %vm4496_vm3, %v4495_v19 }
 0x217   :  { %4129 = vmatprep.subr.mxu1 %v4495_v19 }
 0x218   :  { %v768_v33 = vpop.permute.xlu0 %767  ;;  %v601_v34 = vpop.permute.xlu1 %600 }
 0x219   :  { %4122 = vmatmul.mubr.msk.f32.vlgmr.msra.gmra.mxu1 %vm271_vm4, %v601_v34 }
 0x21a   :  { %4130 = vmatpush3.xpose.msk.msra.mxu1 %vm271_vm4, %v768_v33  ;;  %4131 = vmatprep.mubr.msk.f32.mxu1 %vm4496_vm3, %v4495_v19 }
 0x21b   :  { %4139 = vmatprep.subr.mxu1 %v4495_v19 }
 0x21c   :  { %v949_v35 = vpop.permute.xlu0 %948  ;;  %v766_v36 = vpop.permute.xlu1 %765 }
 0x21d   :  { %4132 = vmatmul.mubr.msk.f32.vlgmr.msra.gmra.mxu1 %vm271_vm4, %v766_v36 }
 0x21e   :  { %4140 = vmatpush3.xpose.msk.msra.mxu1 %vm271_vm4, %v949_v35  ;;  %4141 = vmatprep.mubr.msk.f32.mxu1 %vm4496_vm3, %v4495_v19 }
 0x21f   :  { %4149 = vmatprep.subr.mxu1 %v4495_v19 }
 0x220   :  { %v1114_v37 = vpop.permute.xlu0 %1113  ;;  %v1116_v38 = vpop.permute.xlu1 %1115 }
 0x221   :  { %4142 = vmatmul.mubr.msk.f32.vlgmr.msra.gmra.mxu1 %vm271_vm4, %v247_v28 }
 0x222   :  { %4150 = vmatpush3.xpose.msk.msra.mxu1 %vm271_vm4, %v1116_v38  ;;  %4151 = vmatprep.mubr.msk.f32.mxu1 %vm4496_vm3, %v4495_v19 }
 0x223   :  { %4159 = vmatprep.subr.mxu1 %v4495_v19 }
 0x224   :  { %v1281_v39 = vpop.permute.xlu1 %1280  ;;  %v1279_v40 = vpop.permute.xlu0 %1278 }
 0x225   :  { %4152 = vmatmul.mubr.msk.f32.vlgmr.msra.gmra.mxu1 %vm271_vm4, %v1114_v37 }
 0x226   :  { %4160 = vmatpush3.xpose.msk.msra.mxu1 %vm271_vm4, %v1281_v39  ;;  %4161 = vmatprep.mubr.msk.f32.mxu1 %vm4496_vm3, %v4495_v19 }
 0x227   :  { %4169 = vmatprep.subr.mxu1 %v4495_v19 }
 0x228   :  { %v1446_v41 = vpop.permute.xlu1 %1445  ;;  %v1444_v42 = vpop.permute.xlu0 %1443 }
 0x229   :  { %4162 = vmatmul.mubr.msk.f32.vlgmr.msra.gmra.mxu1 %vm271_vm4, %v1279_v40 }
 0x22a   :  { %4170 = vmatpush3.xpose.msk.msra.mxu1 %vm271_vm4, %v1446_v41  ;;  %4171 = vmatprep.mubr.msk.f32.mxu1 %vm4496_vm3, %v4495_v19 }
 0x22d   :  { %4172 = vmatmul.mubr.msk.f32.vlgmr.msra.gmra.mxu1 %vm271_vm4, %v1444_v42 }
 0x2d4   :  { %v343_v43 = vpop.f32.mrf.mxu0 }
 0x2d5   :  { %v509_v44 = vpop.f32.mrf.mxu1  ;;  %v347_v45 = vsel %vm271_vm4, %v343_v43, -inf }
 0x2d6   :  { %348 = vmax.xlane.f32.xlu1 %v347_v45  ;;  %v4103_v46 = vpop.f32.mrf.mxu0  ;;  %v513_v47 = vsel %vm271_vm4, %v509_v44, -inf }
 0x2d7   :  { %514 = vmax.xlane.f32.xlu0 %v513_v47  ;;  %v4113_v48 = vpop.f32.mrf.mxu1 }
 0x2d9   :  { %v674_v49 = vpop.f32.mrf.mxu1 }
 0x2da   :  { %v678_v50 = vsel %vm271_vm4, %v674_v49, -inf }
 0x2db   :  { %679 = vmax.xlane.f32.xlu0 %v678_v50  ;;  %v4123_v51 = vpop.f32.mrf.mxu1 }
 0x2dd   :  { %v839_v52 = vpop.f32.mrf.mxu1 }
 0x2de   :  { %v843_v53 = vsel %vm271_vm4, %v839_v52, -inf }
 0x2df   :  { %v4133_v54 = vpop.f32.mrf.mxu1  ;;  %844 = vmax.xlane.f32.xlu1 %v843_v53 }
 0x2e1   :  { %v1021_v55 = vpop.f32.mrf.mxu1 }
 0x2e2   :  { %v1025_v56 = vsel %vm271_vm4, %v1021_v55, -inf }
 0x2e3   :  { %1026 = vmax.xlane.f32.xlu0 %v1025_v56  ;;  %v4143_v57 = vpop.f32.mrf.mxu1 }
 0x2e5   :  { %v1187_v58 = vpop.f32.mrf.mxu1 }
 0x2e6   :  { %v1191_v59 = vsel %vm271_vm4, %v1187_v58, -inf }
 0x2e7   :  { %v4153_v60 = vpop.f32.mrf.mxu1  ;;  %1192 = vmax.xlane.f32.xlu1 %v1191_v59 }
 0x2e9   :  { %v1352_v61 = vpop.f32.mrf.mxu1 }
 0x2ea   :  { %v1356_v62 = vsel %vm271_vm4, %v1352_v61, -inf }
 0x2eb   :  { %1357 = vmax.xlane.f32.xlu0 %v1356_v62  ;;  %v4163_v63 = vpop.f32.mrf.mxu1 }
 0x2ed   :  { %v1517_v0 = vpop.f32.mrf.mxu1 }
 0x2ee   :  { %v1521_v1 = vsel %vm271_vm4, %v1517_v0, -inf }
 0x2ef   :  { %v4173_v2 = vpop.f32.mrf.mxu1  ;;  %1522 = vmax.xlane.f32.xlu1 %v1521_v1 }
 0x301   :  { %263 = vrot.lane.b32.xlu0 %v261_v4, %s4504_s13 }
 0x35f   :  { %v349_v14 = vpop.xlane.xlu1 %348 }
 0x360   :  { %v515_v5 = vpop.xlane.xlu0 %514  ;;  %v350_v16 = vsub.f32 %v343_v43, %v349_v14 }
 0x361   :  { %v516_v25 = vsub.f32 %v509_v44, %v515_v5 }
 0x362   :  { %v351_v24 = vmul.f32 1.442695, %v350_v16 }
 0x364   :  { %v680_v6 = vpop.xlane.xlu0 %679 }
 0x365   :  { %v681_v26 = vsub.f32 %v674_v49, %v680_v6 }
 0x367   :  { %v682_v28 = vmul.f32 1.442695, %v681_v26 }
 0x368   :  { %v845_v27 = vpop.xlane.xlu1 %844 }
 0x369   :  { %v846_v29 = vsub.f32 %v839_v52, %v845_v27 }
 0x36b   :  { %v847_v30 = vmul.f32 1.442695, %v846_v29 }
 0x36c   :  { %v1027_v7 = vpop.xlane.xlu0 %1026 }
 0x36d   :  { %v1028_v31 = vsub.f32 %v1021_v55, %v1027_v7 }
 0x36f   :  { %v1029_v34 = vmul.f32 1.442695, %v1028_v31 }
 0x370   :  { %v1193_v32 = vpop.xlane.xlu1 %1192 }
 0x371   :  { %v1194_v35 = vsub.f32 %v1187_v58, %v1193_v32 }
 0x373   :  { %v1195_v39 = vmul.f32 1.442695, %v1194_v35 }
 0x374   :  { %v1358_v11 = vpop.xlane.xlu0 %1357 }
 0x375   :  { %v1359_v15 = vsub.f32 %v1352_v61, %v1358_v11 }
 0x377   :  { %v1360_v22 = vmul.f32 1.442695, %v1359_v15 }
 0x378   :  { %v264_v12 = vpop.permute.xlu0 %263  ;;  %v1523_v37 = vpop.xlane.xlu1 %1522 }
 0x379   :  { %v4689_v13 = vadd.f32 %v264_v12, %v4616_v23  ;;  %4367 = vpow2.f32 %v1360_v22  ;;  %v517_v23 = vmul.f32 1.442695, %v516_v25  ;;  %v1524_v40 = vsub.f32 %v1517_v0, %v1523_v37 }
 0x37a   :  { %4369 = vpow2.f32 %v351_v24  ;;  %v267_v52 = vadd.f32 %v4611_v20, %v264_v12 }
 0x37b   :  { %524 = vrot.lane.b32.xlu0 %v4689_v13, %s4505_s14  ;;  %359 = vrot.lane.b32.xlu1 %v4689_v13, %s4504_s13  ;;  %4371 = vpow2.f32 %v517_v23  ;;  %v1525_v43 = vmul.f32 1.442695, %v1524_v40 }
 0x37c   :  { %4373 = vpow2.f32 %v682_v28 }
 0x37d   :  { %4375 = vpow2.f32 %v847_v30 }
 0x37e   :  { %4377 = vpow2.f32 %v1029_v34 }
 0x37f   :  { %689 = vrot.lane.b32.xlu0 %v4689_v13, %s4506_s15  ;;  %4379 = vpow2.f32 %v1195_v39 }
 0x380   :  { %4381 = vpow2.f32 %v1525_v43 }
 0x386   :  { %v4697_v33 = vpop.eup %4367 }
 0x387   :  { %v4370_v36 = vpop.eup %4369  ;;  %v1362_v38 = vsel %vm271_vm4, %v4697_v33, 0.0 }
 0x388   :  { %v353_v41 = vsel %vm271_vm4, %v4370_v36, 0.0  ;;  %v4372_v42 = vpop.eup %4371 }
 0x389   :  { %v519_v44 = vsel %vm271_vm4, %v4372_v42, 0.0  ;;  %v4374_v45 = vpop.eup %4373 }
 0x38a   :  { %v684_v46 = vsel %vm271_vm4, %v4374_v45, 0.0  ;;  %v4376_v47 = vpop.eup %4375 }
 0x38b   :  { %v849_v48 = vsel %vm271_vm4, %v4376_v47, 0.0  ;;  %v4705_v49 = vpop.eup %4377 }
 0x38c   :  { %v1031_v50 = vsel %vm271_vm4, %v4705_v49, 0.0  ;;  %v4709_v51 = vpop.eup %4379 }
 0x38d   :  { %v1197_v53 = vsel %vm271_vm4, %v4709_v51, 0.0  ;;  %v4714_v54 = vpop.eup %4381 }
 0x38e   :  { %v1527_v55 = vsel %vm271_vm4, %v4714_v54, 0.0 }
 0x39e   :  { %1363 = vadd.xlane.f32.xlu0 %v1362_v38  ;;  %v148_v38 = vld [vmem:[#allocation2 + $0x10] sm:$0xff] }
 0x39f   :  { %354 = vadd.xlane.f32.xlu1 %v353_v41  ;;  %v147_v41 = vld [vmem:[#allocation2 + $0x8] sm:$0xff] }
 0x3a3   :  { %520 = vadd.xlane.f32.xlu1 %v519_v44 }
 0x3a7   :  { %685 = vadd.xlane.f32.xlu1 %v684_v46 }
 0x3ab   :  { %850 = vadd.xlane.f32.xlu1 %v849_v48 }
 0x3af   :  { %1032 = vadd.xlane.f32.xlu1 %v1031_v50 }
 0x3b3   :  { %1198 = vadd.xlane.f32.xlu1 %v1197_v53 }
 0x3b4   :  { %1037 = vrot.lane.b32.xlu0 %v267_v52, %s4504_s13 }
 0x3b7   :  { %1528 = vadd.xlane.f32.xlu1 %v1527_v55 }
 0x3b8   :  { %1202 = vrot.lane.b32.xlu0 %v267_v52, %s4505_s14 }
 0x3bc   :  { %1367 = vrot.lane.b32.xlu0 %v267_v52, %s4506_s15 }
 0x3c0   :  { %1532 = vrot.lane.b32.xlu0 %v267_v52, %s4507_s16 }
 0x3c8   :  { %854 = vrot.lane.b32.xlu1 %v4689_v13, %s4507_s16 }
 0x3ed   :  { %v360_v20 = vpop.permute.xlu1 %359  ;;  %v525_v58 = vpop.permute.xlu0 %524 }
 0x3ee   :  { %4105 = vmatpush3.msra.mxu0 %v360_v20 }
 0x3ef   :  { %4114 = vmatprep.subr.mxu0 %v4495_v19 }
 0x3f1   :  { %v690_v62 = vpop.permute.xlu0 %689 }
 0x427   :  { %v1364_v2 = vpop.xlane.xlu0 %1363 }
 0x428   :  { %v355_v56 = vpop.xlane.xlu1 %354 }
 0x429   :  { %4383 = vrcp.f32 %v355_v56 }
 0x42b   :  { %v1038_v11 = vpop.permute.xlu0 %1037 }
 0x42c   :  { %v521_v57 = vpop.xlane.xlu1 %520 }
 0x42d   :  { %4385 = vrcp.f32 %v521_v57 }
 0x42f   :  { %v1203_v22 = vpop.permute.xlu0 %1202 }
 0x430   :  { %v686_v59 = vpop.xlane.xlu1 %685 }
 0x431   :  { %4387 = vrcp.f32 %v686_v59 }
 0x433   :  { %v1368_v26 = vpop.permute.xlu0 %1367 }
 0x434   :  { %v851_v60 = vpop.xlane.xlu1 %850 }
 0x435   :  { %4389 = vrcp.f32 %v851_v60 }
 0x436   :  { %v4384_v61 = vpop.eup %4383 }
 0x437   :  { %v357_v63 = vmul.f32 %v4384_v61, %v4370_v36  ;;  %v1533_v30 = vpop.permute.xlu0 %1532 }
 0x438   :  { %v1033_v0 = vpop.xlane.xlu1 %1032 }
 0x439   :  { %4391 = vrcp.f32 %v1033_v0  ;;  %4107 = vmatmul.mubr.msk.f32.vlgmr.msra.gmra.mxu0 %vm271_vm4, %v357_v63  ;;  %v1625_v63 = vsub.s32 3, %v4581_v8 }
 0x43a   :  { %v4386_v1 = vpop.eup %4385  ;;  %4115 = vmatpush3.msra.mxu0 %v525_v58  ;;  %4116 = vmatprep.mubr.msk.f32.mxu0 %vm4496_vm3, %v4495_v19 }
 0x43b   :  { %4124 = vmatprep.subr.mxu0 %v4495_v19  ;;  %v523_v4 = vmul.f32 %v4386_v1, %v4372_v42  ;;  %v146_v42 = vld [vmem:[#allocation2] sm:$0xff]  ;;  %v1626_v0 = vrot.slane %v4586_v9, %v1625_v63 }
 0x43c   :  { %v1199_v5 = vpop.xlane.xlu1 %1198 }
 0x43d   :  { %4393 = vrcp.f32 %v1199_v5  ;;  %4117 = vmatmul.mubr.msk.f32.vlgmr.msra.gmra.mxu0 %vm271_vm4, %v523_v4 }
 0x43e   :  { %v4388_v6 = vpop.eup %4387  ;;  %4125 = vmatpush3.msra.mxu0 %v690_v62  ;;  %4126 = vmatprep.mubr.msk.f32.mxu0 %vm4496_vm3, %v4495_v19  ;;  %4395 = vrcp.f32 %v1364_v2 }
 0x43f   :  { %v688_v7 = vmul.f32 %v4388_v6, %v4374_v45  ;;  %4134 = vmatprep.subr.mxu0 %v4495_v19 }
 0x440   :  { %v1529_v12 = vpop.xlane.xlu1 %1528 }
 0x441   :  { %4127 = vmatmul.mubr.msk.f32.vlgmr.msra.gmra.mxu0 %vm271_vm4, %v688_v7  ;;  %4397 = vrcp.f32 %v1529_v12 }
 0x442   :  { %v4390_v13 = vpop.eup %4389  ;;  %4136 = vmatprep.mubr.msk.f32.mxu0 %vm4496_vm3, %v4495_v19 }
 0x443   :  { %v853_v14 = vmul.f32 %v4390_v13, %v4376_v47 }
 0x444   :  { %v855_v15 = vpop.permute.xlu1 %854 }
 0x445   :  { %4135 = vmatpush3.msra.mxu0 %v855_v15 }
 0x446   :  { %v4392_v16 = vpop.eup %4391  ;;  %4137 = vmatmul.mubr.msk.f32.vlgmr.msra.gmra.mxu0 %vm271_vm4, %v853_v14  ;;  %4144 = vmatprep.subr.mxu0 %v4495_v19 }
 0x447   :  { %4145 = vmatpush3.msra.mxu0 %v1038_v11  ;;  %4146 = vmatprep.mubr.msk.f32.mxu0 %vm4496_vm3, %v4495_v19  ;;  %v1035_v24 = vmul.f32 %v4392_v16, %v4705_v49 }
 0x448   :  { %4154 = vmatprep.subr.mxu0 %v4495_v19 }
 0x44a   :  { %v4394_v25 = vpop.eup %4393  ;;  %4147 = vmatmul.mubr.msk.f32.vlgmr.msra.gmra.mxu0 %vm271_vm4, %v1035_v24 }
 0x44b   :  { %4155 = vmatpush3.msra.mxu0 %v1203_v22  ;;  %4156 = vmatprep.mubr.msk.f32.mxu0 %vm4496_vm3, %v4495_v19  ;;  %v1201_v23 = vmul.f32 %v4394_v25, %v4709_v51  ;;  %v4396_v27 = vpop.eup %4395 }
 0x44c   :  { %4164 = vmatprep.subr.mxu0 %v4495_v19  ;;  %v1366_v28 = vmul.f32 %v4396_v27, %v4697_v33  ;;  %v149_v33 = vld [vmem:[#allocation2 + $0x18] sm:$0xff] }
 0x44d   :  { %4179 = vmatprep.subr.mxu1 %v149_v33  ;;  %v153_v27 = vld [vmem:[#allocation2 + $0x38] sm:$0xff] }
 0x44e   :  { %4157 = vmatmul.mubr.msk.f32.vlgmr.msra.gmra.mxu0 %vm271_vm4, %v1201_v23  ;;  %v4398_v29 = vpop.eup %4397  ;;  %4180 = vmatpush3.msra.mxu1 %v149_v33  ;;  %v1745_v33 = vsub.s32 5, %v4581_v8 }
 0x44f   :  { %4165 = vmatpush3.msra.mxu0 %v1368_v26  ;;  %4166 = vmatprep.mubr.msk.f32.mxu0 %vm4496_vm3, %v4495_v19  ;;  %v1531_v31 = vmul.f32 %v4398_v29, %v4714_v54  ;;  %v150_v29 = vld [vmem:[#allocation2 + $0x20] sm:$0xff] }
 0x450   :  { %4174 = vmatprep.subr.mxu0 %v4495_v19  ;;  %4181 = vmatprep.subr.mxu1 %v148_v38 }
 0x451   :  { %4182 = vmatpush3.msra.mxu1 %v148_v38 }
 0x452   :  { %4167 = vmatmul.mubr.msk.f32.vlgmr.msra.gmra.mxu0 %vm271_vm4, %v1366_v28  ;;  %4183 = vmatprep.subr.mxu1 %v147_v41  ;;  %v151_v28 = vld [vmem:[#allocation2 + $0x28] sm:$0xff] }
 0x453   :  { %4175 = vmatpush3.msra.mxu0 %v1533_v30  ;;  %4176 = vmatprep.mubr.msk.f32.mxu0 %vm4496_vm3, %v4495_v19 }
 0x454   :  { %4184 = vmatpush3.msra.mxu1 %v147_v41  ;;  %4190 = vmatprep.subr.mxu0 %v153_v27  ;;  %v1746_v41 = vrot.slane %v4586_v9, %v1745_v33 }
 0x455   :  { %4185 = vmatprep.subr.mxu1 %v146_v42 }
 0x456   :  { %4177 = vmatmul.mubr.msk.f32.vlgmr.msra.gmra.mxu0 %vm271_vm4, %v1531_v31  ;;  %4186 = vmatpush3.msra.mxu1 %v146_v42 }
 0x457   :  { %4191 = vmatpush3.msra.mxu0 %v153_v27  ;;  %v4824_v27 = vld [vmem:[%s5058_s5 + $0x10] sm:$0xff] }
 0x4f9   :  { %v431_v32 = vpop.f32.mrf.mxu0 }
 0x4fb   :  { %v4108_v34 = vpop.f32.mrf.mxu0 }
 0x4fd   :  { %v596_v35 = vpop.f32.mrf.mxu0 }
 0x4fe   :  { %931 = vrot.lane.b32.xlu0 %v596_v35, %s4493_s9 }
 0x4ff   :  { %v4118_v36 = vpop.f32.mrf.mxu0 }
 0x501   :  { %v761_v37 = vpop.f32.mrf.mxu0 }
 0x502   :  { %935 = vrot.lane.b32.xlu1 %v761_v37, %s4508_s17  ;;  %v1739_v37 = vsub.s32 4, %v4581_v8 }
 0x503   :  { %v4128_v39 = vpop.f32.mrf.mxu0 }
 0x504   :  { %v1740_v38 = vrot.slane %v4586_v9, %v1739_v37 }
 0x506   :  { %v926_v40 = vpop.f32.mrf.mxu0 }
 0x507   :  { %939 = vrot.lane.b32.xlu1 %v926_v40, %s4509_s4 }
 0x508   :  { %v4138_v43 = vpop.f32.mrf.mxu0 }
 0x50a   :  { %v1109_v44 = vpop.f32.mrf.mxu0 }
 0x50c   :  { %v4148_v45 = vpop.f32.mrf.mxu0 }
 0x50e   :  { %v1274_v46 = vpop.f32.mrf.mxu0 }
 0x50f   :  { %1609 = vrot.lane.b32.xlu0 %v1274_v46, %s4493_s9 }
 0x510   :  { %v4158_v47 = vpop.f32.mrf.mxu0 }
 0x512   :  { %v1439_v48 = vpop.f32.mrf.mxu0 }
 0x513   :  { %1613 = vrot.lane.b32.xlu0 %v1439_v48, %s4508_s17  ;;  %v157_v48 = vld [vmem:[#allocation2 + $0x58] sm:$0xff] }
 0x514   :  { %v4168_v49 = vpop.f32.mrf.mxu0  ;;  %4201 = vmatprep.subr.mxu1 %v157_v48 }
 0x515   :  { %v156_v49 = vld [vmem:[#allocation2 + $0x50] sm:$0xff] }
 0x516   :  { %v1604_v50 = vpop.f32.mrf.mxu0 }
 0x517   :  { %1617 = vrot.lane.b32.xlu1 %v1604_v50, %s4509_s4  ;;  %v155_v50 = vld [vmem:[#allocation2 + $0x48] sm:$0xff] }
 0x518   :  { %v4178_v51 = vpop.f32.mrf.mxu0 }
 0x519   :  { %v154_v51 = vld [vmem:[#allocation2 + $0x40] sm:$0xff] }
 0x570   :  { %v932_v53 = vpop.permute.xlu0 %931 }
 0x571   :  { %v942_v54 = vsel %vm271_vm4, %v431_v32, %v932_v53 }
 0x574   :  { %v936_v52 = vpop.permute.xlu1 %935 }
 0x575   :  { %v944_v55 = vsel %vm943_vm5, %v942_v54, %v936_v52  ;;  %v1751_v52 = vsub.s32 6, %v4581_v8 }
 0x577   :  { %v1752_v53 = vrot.slane %v4586_v9, %v1751_v52 }
 0x579   :  { %v940_v20 = vpop.permute.xlu1 %939 }
 0x57a   :  { %v946_v56 = vsel %vm945_vm6, %v944_v55, %v940_v20 }
 0x57b   :  { %4187 = vmatprep.mubr.msk.f32.mxu1 %vm160_vm2, %v946_v56 }
 0x581   :  { %v1610_v57 = vpop.permute.xlu0 %1609 }
 0x582   :  { %v1620_v59 = vsel %vm271_vm4, %v1109_v44, %v1610_v57 }
 0x585   :  { %v1614_v58 = vpop.permute.xlu0 %1613 }
 0x586   :  { %v1621_v60 = vsel %vm943_vm5, %v1620_v59, %v1614_v58  ;;  %v1838_v59 = vsub.s32 7, %v4581_v8 }
 0x589   :  { %v1618_v61 = vpop.permute.xlu1 %1617 }
 0x58a   :  { %v1622_v62 = vsel %vm945_vm6, %v1621_v60, %v1618_v61  ;;  %v1839_v60 = vrot.slane %v4586_v9, %v1838_v59 }
 0x58b   :  { %4188 = vmatmul.mubr.msk.f32.vlgmr.msra.gmra.mxu1 %vm160_vm2, %v1622_v62 }
 0x58c   :  { %4202 = vmatpush3.msra.mxu1 %v157_v48 }
 0x58d   :  { %4203 = vmatprep.subr.mxu1 %v156_v49 }
 0x58e   :  { %4204 = vmatpush3.msra.mxu1 %v156_v49 }
 0x58f   :  { %4205 = vmatprep.subr.mxu1 %v155_v50 }
 0x590   :  { %4206 = vmatpush3.msra.mxu1 %v155_v50 }
 0x591   :  { %4207 = vmatprep.subr.mxu1 %v154_v51 }
 0x592   :  { %4208 = vmatpush3.msra.mxu1 %v154_v51  ;;  %v2066_v51 = vrot.slane %v4824_v27, %v4614_v21 }
 0x593   :  { %4223 = vmatprep.subr.mxu1 %v4495_v19 }
 0x64b   :  { %v4189_v1 = vpop.f32.mrf.mxu1 }
 0x64c   :  { %v1705_v2 = vadd.f32 %v4189_v1, %v1626_v0 }
 0x64d   :  { %v1699_v4 = vpop.f32.mrf.mxu1 }
 0x64e   :  { %v1700_v5 = vadd.f32 %v1699_v4, %v1626_v0  ;;  %v1709_v6 = vadd.f32 %v1705_v2, %v4599_v18 }
 0x650   :  { %v1713_v7 = vsel %vm160_vm2, %v1709_v6, 0.0  ;;  %v1708_v11 = vadd.f32 %v1700_v5, %v4597_v17  ;;  %v152_v17 = vld [vmem:[#allocation2 + $0x30] sm:$0xff] }
 0x651   :  { %1714 = vadd.xlane.f32.xlu1 %v1713_v7  ;;  %4192 = vmatprep.subr.mxu0 %v152_v17 }
 0x652   :  { %v1710_v12 = vsel %vm160_vm2, %v1708_v11, 0.0  ;;  %4193 = vmatpush3.msra.mxu0 %v152_v17  ;;  %v2072_v17 = vrot.slane %v4824_v27, %v4589_v10 }
 0x653   :  { %1711 = vadd.xlane.f32.xlu0 %v1710_v12  ;;  %4194 = vmatprep.subr.mxu0 %v151_v28 }
 0x654   :  { %4195 = vmatpush3.msra.mxu0 %v151_v28 }
 0x655   :  { %4196 = vmatprep.subr.mxu0 %v150_v29 }
 0x656   :  { %4197 = vmatpush3.msra.mxu0 %v150_v29 }
 0x6da   :  { %v1715_v13 = vpop.xlane.xlu1 %1714 }
 0x6db   :  { %v1718_v14 = vmul.f32 0.03125, %v1715_v13 }
 0x6dc   :  { %v1712_v15 = vpop.xlane.xlu0 %1711 }
 0x6dd   :  { %v1717_v16 = vmul.f32 0.03125, %v1712_v15  ;;  %v1720_v22 = vsub.f32 %v1709_v6, %v1718_v14 }
 0x6df   :  { %v1719_v24 = vsub.f32 %v1708_v11, %v1717_v16  ;;  %v1722_v26 = vmul.f32 %v1720_v22, %v1720_v22 }
 0x6e1   :  { %v1721_v25 = vmul.f32 %v1719_v24, %v1719_v24  ;;  %v1726_v18 = vsel %vm160_vm2, %v1722_v26, 0.0  ;;  %v3924_v26 = vld [vmem:[%s5056_s3 + $0x28] sm:$0xff] }
 0x6e3   :  { %v1723_v23 = vsel %vm160_vm2, %v1721_v25, 0.0  ;;  %v3926_v25 = vld [vmem:[%s5056_s3 + $0x38] sm:$0xff] }
 0x6e4   :  { %1724 = vadd.xlane.f32.xlu0 %v1723_v23  ;;  %v3925_v23 = vld [vmem:[%s5056_s3 + $0x30] sm:$0xff]  ;;  %4212 = vmatprep.subr.mxu0 %v3926_v25 }
 0x6e8   :  { %1727 = vadd.xlane.f32.xlu0 %v1726_v18  ;;  %v3923_v18 = vld [vmem:[%s5056_s3 + $0x20] sm:$0xff] }
 0x76d   :  { %v1725_v30 = vpop.xlane.xlu0 %1724 }
 0x76e   :  { %v1729_v31 = vmul.f32 0.03125, %v1725_v30 }
 0x770   :  { %v1731_v32 = vadd.f32 1e-12, %v1729_v31 }
 0x771   :  { %v1728_v34 = vpop.xlane.xlu0 %1727 }
 0x772   :  { %4399 = vrsqrt.f32 %v1731_v32  ;;  %v1730_v35 = vmul.f32 0.03125, %v1728_v34 }
 0x774   :  { %v1732_v36 = vadd.f32 1e-12, %v1730_v35  ;;  %v159_v35 = vld [vmem:[%s5058_s5 + $0x8] sm:$0x3] }
 0x776   :  { %4401 = vrsqrt.f32 %v1732_v36 }
 0x77f   :  { %v4400_v39 = vpop.eup %4399 }
 0x780   :  { %v1735_v40 = vmul.f32 %v4400_v39, %v1719_v24 }
 0x782   :  { %v1741_v42 = vmul.f32 %v1740_v38, %v1735_v40 }
 0x783   :  { %v4402_v43 = vpop.eup %4401 }
 0x784   :  { %v1736_v44 = vmul.f32 %v4402_v43, %v1720_v22  ;;  %v1747_v45 = vadd.f32 %v1746_v41, %v1741_v42  ;;  %v1958_v43 = vrot.slane %v159_v35, %v4589_v10 }
 0x786   :  { %v1742_v46 = vmul.f32 %v1740_v38, %v1736_v44  ;;  %4198 = vmatprep.mubr.msk.f32.mxu0 %vm160_vm2, %v1747_v45  ;;  %v1952_v38 = vrot.slane %v159_v35, %v4614_v21 }
 0x788   :  { %v1748_v47 = vadd.f32 %v1746_v41, %v1742_v46 }
 0x78a   :  { %4199 = vmatmul.mubr.msk.f32.vlgmr.msra.gmra.mxu0 %vm160_vm2, %v1748_v47 }
 0x78b   :  { %4213 = vmatpush3.msra.mxu0 %v3926_v25 }
 0x78c   :  { %4214 = vmatprep.subr.mxu0 %v3925_v23 }
 0x78d   :  { %4215 = vmatpush3.msra.mxu0 %v3925_v23 }
 0x78e   :  { %4216 = vmatprep.subr.mxu0 %v3924_v26 }
 0x78f   :  { %4217 = vmatpush3.msra.mxu0 %v3924_v26 }
 0x790   :  { %4218 = vmatprep.subr.mxu0 %v3923_v18 }
 0x791   :  { %4219 = vmatpush3.msra.mxu0 %v3923_v18 }
 0x792   :  { %4228 = vmatprep.subr.mxu0 %v4495_v19 }
 0x84a   :  { %v4200_v54 = vpop.f32.mrf.mxu0 }
 0x84b   :  { %v1831_v55 = vadd.f32 %v4200_v54, %v1752_v53 }
 0x84c   :  { %v1825_v20 = vpop.f32.mrf.mxu0 }
 0x84d   :  { %v1826_v56 = vadd.f32 %v1825_v20, %v1752_v53  ;;  %v1835_v58 = vmax.f32 %v1831_v55, 0.0 }
 0x84f   :  { %v1834_v57 = vmax.f32 %v1826_v56, 0.0 }
 0x851   :  { %4209 = vmatprep.mubr.msk.f32.mxu1 %vm160_vm2, %v1834_v57 }
 0x852   :  { %4210 = vmatmul.mubr.msk.f32.vlgmr.msra.gmra.mxu1 %vm160_vm2, %v1835_v58 }
 0x853   :  { %4225 = vmatprep.mubr.msk.f32.mxu1 %vm4496_vm3, %v4495_v19 }
 0x912   :  { %v4211_v61 = vpop.f32.mrf.mxu1 }
 0x913   :  { %v1918_v62 = vadd.f32 %v4211_v61, %v1839_v60 }
 0x914   :  { %v1912_v0 = vpop.f32.mrf.mxu1 }
 0x915   :  { %v1913_v1 = vadd.f32 %v1912_v0, %v1839_v60  ;;  %v1922_v2 = vadd.f32 %v1918_v62, %v1748_v47 }
 0x917   :  { %v1926_v4 = vsel %vm160_vm2, %v1922_v2, 0.0  ;;  %v1921_v5 = vadd.f32 %v1913_v1, %v1747_v45 }
 0x918   :  { %1927 = vadd.xlane.f32.xlu0 %v1926_v4 }
 0x919   :  { %v1923_v6 = vsel %vm160_vm2, %v1921_v5, 0.0 }
 0x91a   :  { %1924 = vadd.xlane.f32.xlu1 %v1923_v6 }
 0x9a1   :  { %v1928_v7 = vpop.xlane.xlu0 %1927 }
 0x9a2   :  { %v1930_v11 = vmul.f32 0.03125, %v1928_v7 }
 0x9a3   :  { %v1925_v12 = vpop.xlane.xlu1 %1924 }
 0x9a4   :  { %v1932_v13 = vsub.f32 %v1922_v2, %v1930_v11  ;;  %v1929_v14 = vmul.f32 0.03125, %v1925_v12 }
 0x9a6   :  { %v1931_v15 = vsub.f32 %v1921_v5, %v1929_v14  ;;  %v1934_v16 = vmul.f32 %v1932_v13, %v1932_v13 }
 0x9a8   :  { %v1938_v9 = vsel %vm160_vm2, %v1934_v16, 0.0  ;;  %v1933_v22 = vmul.f32 %v1931_v15, %v1931_v15 }
 0x9a9   :  { %1939 = vadd.xlane.f32.xlu0 %v1938_v9 }
 0x9aa   :  { %v1935_v24 = vsel %vm160_vm2, %v1933_v22, 0.0 }
 0x9ab   :  { %1936 = vadd.xlane.f32.xlu1 %v1935_v24 }
 0x9bc   :  { %2074 = vrot.lane.b32.xlu1 %v2072_v17, %s4494_s25 }
 0xa32   :  { %v1940_v28 = vpop.xlane.xlu0 %1939 }
 0xa33   :  { %v1942_v29 = vmul.f32 0.03125, %v1940_v28 }
 0xa34   :  { %v1937_v30 = vpop.xlane.xlu1 %1936 }
 0xa35   :  { %v1944_v31 = vadd.f32 1e-12, %v1942_v29  ;;  %v1941_v32 = vmul.f32 0.03125, %v1937_v30 }
 0xa37   :  { %4403 = vrsqrt.f32 %v1944_v31  ;;  %v1943_v34 = vadd.f32 1e-12, %v1941_v32 }
 0xa38   :  { %v2075_v48 = vpop.permute.xlu1 %2074 }
 0xa39   :  { %4405 = vrsqrt.f32 %v1943_v34 }
 0xa44   :  { %v4404_v36 = vpop.eup %4403 }
 0xa45   :  { %v1948_v39 = vmul.f32 %v4404_v36, %v1932_v13 }
 0xa46   :  { %v4406_v40 = vpop.eup %4405 }
 0xa47   :  { %v1947_v41 = vmul.f32 %v4406_v40, %v1931_v15  ;;  %v1954_v42 = vmul.f32 %v1952_v38, %v1948_v39  ;;  %v2082_v40 = vrot.slane %v4824_v27, %v260_v3 }
 0xa49   :  { %v1953_v44 = vmul.f32 %v1952_v38, %v1947_v41  ;;  %v4836_v46 = vadd.f32 %v1958_v43, %v1954_v42 }
 0xa4b   :  { %v4834_v45 = vadd.f32 %v1958_v43, %v1953_v44 }
 0xa4d   :  { %4220 = vmatprep.mubr.msk.f32.mxu0 %vm160_vm2, %v4834_v45 }
 0xa4e   :  { %4221 = vmatmul.mubr.msk.f32.vlgmr.msra.gmra.mxu0 %vm160_vm2, %v4836_v46 }
 0xa4f   :  { %4230 = vmatprep.mubr.msk.f32.mxu0 %vm4496_vm3, %v4495_v19 }
 0xb0e   :  { %v4844_v47 = vpop.f32.mrf.mxu0 }
 0xb0f   :  { %v2078_v54 = vadd.f32 %v4844_v47, %v2075_v48  ;;  %v2068_v55 = vadd.f32 %v4844_v47, %v2066_v51 }
 0xb10   :  { %v4846_v49 = vpop.f32.mrf.mxu0 }
 0xb11   :  { %v2077_v50 = vadd.f32 %v2075_v48, %v4846_v49  ;;  %v2067_v53 = vadd.f32 %v2066_v51, %v4846_v49 }
 0xb13   :  { %2257 = vrot.lane.b32.xlu1 %v2077_v50, %s4497_s2  ;;  %2090 = vrot.lane.b32.xlu0 %v2077_v50, %s4498_s28 }
 0xb17   :  { %2255 = vrot.lane.b32.xlu1 %v2067_v53, %s4500_s30  ;;  %2422 = vrot.lane.b32.xlu0 %v2077_v50, %s4499_s29 }
 0xb1b   :  { %2420 = vrot.lane.b32.xlu1 %v2067_v53, %s4502_s11  ;;  %2587 = vrot.lane.b32.xlu0 %v2077_v50, %s4501_s10 }
 0xb1f   :  { %2585 = vrot.lane.b32.xlu1 %v2067_v53, %s4503_s12  ;;  %2766 = vrot.lane.b32.xlu0 %v2078_v54, %s4498_s28 }
 0xb23   :  { %2933 = vrot.lane.b32.xlu1 %v2078_v54, %s4497_s2  ;;  %2931 = vrot.lane.b32.xlu0 %v2068_v55, %s4500_s30 }
 0xb27   :  { %3098 = vrot.lane.b32.xlu1 %v2078_v54, %s4499_s29  ;;  %3096 = vrot.lane.b32.xlu0 %v2068_v55, %s4502_s11 }
 0xb2b   :  { %3263 = vrot.lane.b32.xlu1 %v2078_v54, %s4501_s10  ;;  %3261 = vrot.lane.b32.xlu0 %v2068_v55, %s4503_s12 }
 0xb85   :  { %v2258_v20 = vpop.permute.xlu1 %2257  ;;  %v2091_v56 = vpop.permute.xlu0 %2090 }
 0xb86   :  { %4224 = vmatpush3.xpose.msk.msra.mxu1 %vm271_vm4, %v2091_v56 }
 0xb87   :  { %4233 = vmatprep.subr.mxu1 %v4495_v19 }
 0xb89   :  { %v2256_v57 = vpop.permute.xlu1 %2255  ;;  %4226 = vmatmul.mubr.msk.f32.vlgmr.msra.gmra.mxu1 %vm271_vm4, %v2067_v53  ;;  %v2423_v58 = vpop.permute.xlu0 %2422 }
 0xb8a   :  { %4234 = vmatpush3.xpose.msk.msra.mxu1 %vm271_vm4, %v2258_v20  ;;  %4235 = vmatprep.mubr.msk.f32.mxu1 %vm4496_vm3, %v4495_v19 }
 0xb8b   :  { %4243 = vmatprep.subr.mxu1 %v4495_v19 }
 0xb8d   :  { %v2421_v60 = vpop.permute.xlu1 %2420  ;;  %4236 = vmatmul.mubr.msk.f32.vlgmr.msra.gmra.mxu1 %vm271_vm4, %v2256_v57  ;;  %v2588_v61 = vpop.permute.xlu0 %2587 }
 0xb8e   :  { %4244 = vmatpush3.xpose.msk.msra.mxu1 %vm271_vm4, %v2423_v58  ;;  %4245 = vmatprep.mubr.msk.f32.mxu1 %vm4496_vm3, %v4495_v19 }
 0xb8f   :  { %4253 = vmatprep.subr.mxu1 %v4495_v19 }
 0xb91   :  { %v2586_v62 = vpop.permute.xlu1 %2585  ;;  %4246 = vmatmul.mubr.msk.f32.vlgmr.msra.gmra.mxu1 %vm271_vm4, %v2421_v60  ;;  %v2767_v0 = vpop.permute.xlu0 %2766 }
 0xb92   :  { %4254 = vmatpush3.xpose.msk.msra.mxu1 %vm271_vm4, %v2588_v61  ;;  %4255 = vmatprep.mubr.msk.f32.mxu1 %vm4496_vm3, %v4495_v19 }
 0xb93   :  { %4263 = vmatprep.subr.mxu1 %v4495_v19 }
 0xb95   :  { %v2934_v1 = vpop.permute.xlu1 %2933  ;;  %4256 = vmatmul.mubr.msk.f32.vlgmr.msra.gmra.mxu1 %vm271_vm4, %v2586_v62  ;;  %v2932_v2 = vpop.permute.xlu0 %2931 }
 0xb96   :  { %4264 = vmatpush3.xpose.msk.msra.mxu1 %vm271_vm4, %v2767_v0  ;;  %4265 = vmatprep.mubr.msk.f32.mxu1 %vm4496_vm3, %v4495_v19 }
 0xb97   :  { %4273 = vmatprep.subr.mxu1 %v4495_v19 }
 0xb99   :  { %4266 = vmatmul.mubr.msk.f32.vlgmr.msra.gmra.mxu1 %vm271_vm4, %v2068_v55  ;;  %v3099_v4 = vpop.permute.xlu1 %3098  ;;  %v3097_v5 = vpop.permute.xlu0 %3096 }
 0xb9a   :  { %4274 = vmatpush3.xpose.msk.msra.mxu1 %vm271_vm4, %v2934_v1  ;;  %4275 = vmatprep.mubr.msk.f32.mxu1 %vm4496_vm3, %v4495_v19 }
 0xb9b   :  { %4283 = vmatprep.subr.mxu1 %v4495_v19 }
 0xb9d   :  { %4276 = vmatmul.mubr.msk.f32.vlgmr.msra.gmra.mxu1 %vm271_vm4, %v2932_v2  ;;  %v3264_v6 = vpop.permute.xlu1 %3263  ;;  %v3262_v7 = vpop.permute.xlu0 %3261 }
 0xb9e   :  { %4284 = vmatpush3.xpose.msk.msra.mxu1 %vm271_vm4, %v3099_v4  ;;  %4285 = vmatprep.mubr.msk.f32.mxu1 %vm4496_vm3, %v4495_v19 }
 0xb9f   :  { %4293 = vmatprep.subr.mxu1 %v4495_v19 }
 0xba1   :  { %4286 = vmatmul.mubr.msk.f32.vlgmr.msra.gmra.mxu1 %vm271_vm4, %v3097_v5 }
 0xba2   :  { %4294 = vmatpush3.xpose.msk.msra.mxu1 %vm271_vm4, %v3264_v6  ;;  %4295 = vmatprep.mubr.msk.f32.mxu1 %vm4496_vm3, %v4495_v19 }
 0xba5   :  { %4296 = vmatmul.mubr.msk.f32.vlgmr.msra.gmra.mxu1 %vm271_vm4, %v3262_v7 }
 0xc49   :  { %v2163_v11 = vpop.f32.mrf.mxu1 }
 0xc4a   :  { %v2167_v12 = vsel %vm271_vm4, %v2163_v11, -inf }
 0xc4b   :  { %2168 = vmax.xlane.f32.xlu1 %v2167_v12  ;;  %v4227_v13 = vpop.f32.mrf.mxu1 }
 0xc4d   :  { %v2329_v14 = vpop.f32.mrf.mxu1 }
 0xc4e   :  { %v2333_v15 = vsel %vm271_vm4, %v2329_v14, -inf }
 0xc4f   :  { %2334 = vmax.xlane.f32.xlu0 %v2333_v15  ;;  %v4237_v16 = vpop.f32.mrf.mxu1 }
 0xc51   :  { %v2494_v9 = vpop.f32.mrf.mxu1 }
 0xc52   :  { %v2498_v22 = vsel %vm271_vm4, %v2494_v9, -inf }
 0xc53   :  { %2499 = vmax.xlane.f32.xlu0 %v2498_v22  ;;  %v4247_v24 = vpop.f32.mrf.mxu1 }
 0xc55   :  { %v2659_v25 = vpop.f32.mrf.mxu1 }
 0xc56   :  { %v2663_v23 = vsel %vm271_vm4, %v2659_v25, -inf }
 0xc57   :  { %2664 = vmax.xlane.f32.xlu1 %v2663_v23  ;;  %v4257_v26 = vpop.f32.mrf.mxu1 }
 0xc59   :  { %v2839_v18 = vpop.f32.mrf.mxu1 }
 0xc5a   :  { %v2843_v17 = vsel %vm271_vm4, %v2839_v18, -inf }
 0xc5b   :  { %2844 = vmax.xlane.f32.xlu0 %v2843_v17  ;;  %v4267_v28 = vpop.f32.mrf.mxu1 }
 0xc5d   :  { %v3005_v29 = vpop.f32.mrf.mxu1 }
 0xc5e   :  { %v3009_v30 = vsel %vm271_vm4, %v3005_v29, -inf }
 0xc5f   :  { %3010 = vmax.xlane.f32.xlu1 %v3009_v30  ;;  %v4277_v31 = vpop.f32.mrf.mxu1 }
 0xc61   :  { %v3170_v32 = vpop.f32.mrf.mxu1 }
 0xc62   :  { %v3174_v34 = vsel %vm271_vm4, %v3170_v32, -inf }
 0xc63   :  { %3175 = vmax.xlane.f32.xlu0 %v3174_v34  ;;  %v4287_v35 = vpop.f32.mrf.mxu1 }
 0xc65   :  { %v3335_v36 = vpop.f32.mrf.mxu1 }
 0xc66   :  { %v3339_v38 = vsel %vm271_vm4, %v3335_v36, -inf }
 0xc67   :  { %3340 = vmax.xlane.f32.xlu1 %v3339_v38  ;;  %v4297_v39 = vpop.f32.mrf.mxu1 }
 0xc79   :  { %2084 = vrot.lane.b32.xlu0 %v2082_v40, %s4504_s13 }
 0xcd4   :  { %v2169_v51 = vpop.xlane.xlu1 %2168 }
 0xcd5   :  { %v2170_v54 = vsub.f32 %v2163_v11, %v2169_v51 }
 0xcd7   :  { %v2171_v3 = vmul.f32 1.442695, %v2170_v54 }
 0xcd8   :  { %v2335_v41 = vpop.xlane.xlu0 %2334 }
 0xcd9   :  { %v2336_v20 = vsub.f32 %v2329_v14, %v2335_v41 }
 0xcdb   :  { %v2337_v56 = vmul.f32 1.442695, %v2336_v20 }
 0xcdc   :  { %v2500_v42 = vpop.xlane.xlu0 %2499 }
 0xcdd   :  { %v2501_v57 = vsub.f32 %v2494_v9, %v2500_v42 }
 0xcdf   :  { %v2502_v60 = vmul.f32 1.442695, %v2501_v57 }
 0xce0   :  { %v2665_v58 = vpop.xlane.xlu1 %2664 }
 0xce4   :  { %v2845_v43 = vpop.xlane.xlu0 %2844 }
 0xce5   :  { %v2846_v62 = vsub.f32 %v2839_v18, %v2845_v43 }
 0xce7   :  { %v2847_v2 = vmul.f32 1.442695, %v2846_v62 }
 0xce8   :  { %v3011_v0 = vpop.xlane.xlu1 %3010 }
 0xce9   :  { %v3012_v4 = vsub.f32 %v3005_v29, %v3011_v0 }
 0xceb   :  { %v3013_v11 = vmul.f32 1.442695, %v3012_v4 }
 0xcec   :  { %v3176_v44 = vpop.xlane.xlu0 %3175 }
 0xced   :  { %v3177_v53 = vsub.f32 %v3170_v32, %v3176_v44 }
 0xcef   :  { %v3178_v55 = vmul.f32 1.442695, %v3177_v53 }
 0xcf0   :  { %v2085_v48 = vpop.permute.xlu0 %2084  ;;  %v3341_v6 = vpop.xlane.xlu1 %3340 }
 0xcf1   :  { %v2087_v50 = vadd.f32 %v2085_v48, %v4846_v49  ;;  %4407 = vpow2.f32 %v3178_v55  ;;  %v2666_v49 = vsub.f32 %v2659_v25, %v2665_v58  ;;  %v3342_v12 = vsub.f32 %v3335_v36, %v3341_v6 }
 0xcf2   :  { %4409 = vpow2.f32 %v2171_v3  ;;  %v2088_v17 = vadd.f32 %v4844_v47, %v2085_v48 }
 0xcf3   :  { %2344 = vrot.lane.b32.xlu0 %v2087_v50, %s4505_s14  ;;  %2179 = vrot.lane.b32.xlu1 %v2087_v50, %s4504_s13  ;;  %4411 = vpow2.f32 %v2337_v56  ;;  %v2667_v61 = vmul.f32 1.442695, %v2666_v49  ;;  %v3343_v15 = vmul.f32 1.442695, %v3342_v12 }
 0xcf4   :  { %4413 = vpow2.f32 %v2502_v60 }
 0xcf5   :  { %4415 = vpow2.f32 %v2667_v61 }
 0xcf6   :  { %4417 = vpow2.f32 %v2847_v2 }
 0xcf7   :  { %2509 = vrot.lane.b32.xlu0 %v2087_v50, %s4506_s15  ;;  %4419 = vpow2.f32 %v3013_v11 }
 0xcf8   :  { %4421 = vpow2.f32 %v3343_v15 }
 0xcfe   :  { %v4921_v1 = vpop.eup %4407 }
 0xcff   :  { %v4410_v5 = vpop.eup %4409  ;;  %v3180_v7 = vsel %vm271_vm4, %v4921_v1, 0.0 }
 0xd00   :  { %v2173_v13 = vsel %vm271_vm4, %v4410_v5, 0.0  ;;  %v4412_v14 = vpop.eup %4411 }
 0xd01   :  { %v2339_v16 = vsel %vm271_vm4, %v4412_v14, 0.0  ;;  %v4414_v9 = vpop.eup %4413 }
 0xd02   :  { %v2504_v22 = vsel %vm271_vm4, %v4414_v9, 0.0  ;;  %v4416_v24 = vpop.eup %4415 }
 0xd03   :  { %v2669_v25 = vsel %vm271_vm4, %v4416_v24, 0.0  ;;  %v4929_v23 = vpop.eup %4417 }
 0xd04   :  { %v2849_v26 = vsel %vm271_vm4, %v4929_v23, 0.0  ;;  %v4933_v18 = vpop.eup %4419 }
 0xd05   :  { %v3015_v28 = vsel %vm271_vm4, %v4933_v18, 0.0  ;;  %v4938_v29 = vpop.eup %4421 }
 0xd06   :  { %v3345_v30 = vsel %vm271_vm4, %v4938_v29, 0.0 }
 0xd16   :  { %3181 = vadd.xlane.f32.xlu0 %v3180_v7 }
 0xd17   :  { %2174 = vadd.xlane.f32.xlu1 %v2173_v13 }
 0xd1b   :  { %2340 = vadd.xlane.f32.xlu1 %v2339_v16 }
 0xd1f   :  { %2505 = vadd.xlane.f32.xlu1 %v2504_v22  ;;  %v1967_v22 = vld [vmem:[#allocation2 + $0x60] sm:$0xff] }
 0xd23   :  { %2670 = vadd.xlane.f32.xlu1 %v2669_v25 }
 0xd27   :  { %2850 = vadd.xlane.f32.xlu1 %v2849_v26 }
 0xd2b   :  { %3016 = vadd.xlane.f32.xlu1 %v3015_v28 }
 0xd2c   :  { %2855 = vrot.lane.b32.xlu0 %v2088_v17, %s4504_s13 }
 0xd2f   :  { %3346 = vadd.xlane.f32.xlu1 %v3345_v30 }
 0xd30   :  { %3020 = vrot.lane.b32.xlu0 %v2088_v17, %s4505_s14  ;;  %s4510_s14 = smov [#allocation5]  }
 0xd34   :  { %3185 = vrot.lane.b32.xlu0 %v2088_v17, %s4506_s15  ;;  %s3878_s15 = sshll.u32 %s4510_s14, 4  ;;  %s3879_s15 = int_to_ptr.vmem [resolvable:$true] %s3878_s15 }
 0xd35   :  { %p4472_p6 = scmp.lt.s32.totalorder %s3879_s15, %s3879_s15 }
 0xd38   :  { %3350 = vrot.lane.b32.xlu0 %v2088_v17, %s4507_s16 }
 0xd40   :  { %2674 = vrot.lane.b32.xlu1 %v2087_v50, %s4507_s16  ;;  %s4467_s16 = scalar_lea.vmem %s3879_s15, 32 }
 0xd41   :  { %p4468_p5 = scmp.ne.s32.totalorder %s3879_s15, %s4467_s16  ;;  %p4473_p7 = scmp.lt.s32.totalorder %s4467_s16, %s4467_s16 }
 0xd43   :  { %p4474_p8 = por %p4473_p7, %p4472_p6 }
 0xd45   :  { %p4475_p9 = pnand %p4474_p8, %p4468_p5 }
 0xd65   :  { %v2180_v47 = vpop.permute.xlu1 %2179  ;;  %v2345_v34 = vpop.permute.xlu0 %2344 }
 0xd66   :  { %4229 = vmatpush3.msra.mxu0 %v2180_v47 }
 0xd67   :  { %4238 = vmatprep.subr.mxu0 %v4495_v19 }
 0xd69   :  { %v2510_v39 = vpop.permute.xlu0 %2509 }
 0xd9f   :  { %v3182_v43 = vpop.xlane.xlu0 %3181 }
 0xda0   :  { %v2175_v31 = vpop.xlane.xlu1 %2174 }
 0xda1   :  { %4423 = vrcp.f32 %v2175_v31 }
 0xda3   :  { %v2856_v53 = vpop.permute.xlu0 %2855 }
 0xda4   :  { %v2341_v32 = vpop.xlane.xlu1 %2340 }
 0xda5   :  { %4425 = vrcp.f32 %v2341_v32 }
 0xda7   :  { %v3021_v57 = vpop.permute.xlu0 %3020 }
 0xda8   :  { %v2506_v35 = vpop.xlane.xlu1 %2505 }
 0xda9   :  { %4427 = vrcp.f32 %v2506_v35 }
 0xdab   :  { %v3186_v61 = vpop.permute.xlu0 %3185 }
 0xdac   :  { %v2671_v36 = vpop.xlane.xlu1 %2670 }
 0xdad   :  { %4429 = vrcp.f32 %v2671_v36 }
 0xdae   :  { %v4424_v38 = vpop.eup %4423 }
 0xdaf   :  { %v2177_v40 = vmul.f32 %v4424_v38, %v4410_v5  ;;  %v3351_v4 = vpop.permute.xlu0 %3350 }
 0xdb0   :  { %v2851_v41 = vpop.xlane.xlu1 %2850 }
 0xdb1   :  { %4431 = vrcp.f32 %v2851_v41  ;;  %4231 = vmatmul.mubr.msk.f32.vlgmr.msra.gmra.mxu0 %vm271_vm4, %v2177_v40 }
 0xdb2   :  { %v4426_v42 = vpop.eup %4425  ;;  %4239 = vmatpush3.msra.mxu0 %v2345_v34  ;;  %4240 = vmatprep.mubr.msk.f32.mxu0 %vm4496_vm3, %v4495_v19 }
 0xdb3   :  { %4248 = vmatprep.subr.mxu0 %v4495_v19  ;;  %v2343_v44 = vmul.f32 %v4426_v42, %v4412_v14  ;;  %v1969_v14 = vld [vmem:[#allocation2 + $0x70] sm:$0xff] }
 0xdb4   :  { %v3017_v48 = vpop.xlane.xlu1 %3016 }
 0xdb5   :  { %4433 = vrcp.f32 %v3017_v48  ;;  %4241 = vmatmul.mubr.msk.f32.vlgmr.msra.gmra.mxu0 %vm271_vm4, %v2343_v44  ;;  %v3444_v44 = vrot.slane %v4824_v27, %v1625_v63 }
 0xdb6   :  { %v4428_v50 = vpop.eup %4427  ;;  %4249 = vmatpush3.msra.mxu0 %v2510_v39  ;;  %4250 = vmatprep.mubr.msk.f32.mxu0 %vm4496_vm3, %v4495_v19  ;;  %4435 = vrcp.f32 %v3182_v43 }
 0xdb7   :  { %v2508_v51 = vmul.f32 %v4428_v50, %v4414_v9  ;;  %4258 = vmatprep.subr.mxu0 %v4495_v19  ;;  %v1968_v9 = vld [vmem:[#allocation2 + $0x68] sm:$0xff] }
 0xdb8   :  { %v3347_v54 = vpop.xlane.xlu1 %3346 }
 0xdb9   :  { %4251 = vmatmul.mubr.msk.f32.vlgmr.msra.gmra.mxu0 %vm271_vm4, %v2508_v51  ;;  %4437 = vrcp.f32 %v3347_v54 }
 0xdba   :  { %v4430_v55 = vpop.eup %4429  ;;  %4260 = vmatprep.mubr.msk.f32.mxu0 %vm4496_vm3, %v4495_v19 }
 0xdbb   :  { %v2673_v3 = vmul.f32 %v4430_v55, %v4416_v24 }
 0xdbc   :  { %v2675_v20 = vpop.permute.xlu1 %2674 }
 0xdbd   :  { %4259 = vmatpush3.msra.mxu0 %v2675_v20 }
 0xdbe   :  { %v4432_v56 = vpop.eup %4431  ;;  %4261 = vmatmul.mubr.msk.f32.vlgmr.msra.gmra.mxu0 %vm271_vm4, %v2673_v3  ;;  %4268 = vmatprep.subr.mxu0 %v4495_v19 }
 0xdbf   :  { %4269 = vmatpush3.msra.mxu0 %v2856_v53  ;;  %4270 = vmatprep.mubr.msk.f32.mxu0 %vm4496_vm3, %v4495_v19  ;;  %v2853_v58 = vmul.f32 %v4432_v56, %v4929_v23 }
 0xdc0   :  { %4278 = vmatprep.subr.mxu0 %v4495_v19 }
 0xdc2   :  { %v4434_v60 = vpop.eup %4433  ;;  %4271 = vmatmul.mubr.msk.f32.vlgmr.msra.gmra.mxu0 %vm271_vm4, %v2853_v58 }
 0xdc3   :  { %4279 = vmatpush3.msra.mxu0 %v3021_v57  ;;  %4280 = vmatprep.mubr.msk.f32.mxu0 %vm4496_vm3, %v4495_v19  ;;  %v3019_v49 = vmul.f32 %v4434_v60, %v4933_v18  ;;  %v4436_v62 = vpop.eup %4435 }
 0xdc4   :  { %4288 = vmatprep.subr.mxu0 %v4495_v19  ;;  %v3184_v0 = vmul.f32 %v4436_v62, %v4921_v1  ;;  %v1970_v1 = vld [vmem:[#allocation2 + $0x78] sm:$0xff] }
 0xdc5   :  { %4303 = vmatprep.subr.mxu1 %v1970_v1 }
 0xdc6   :  { %4281 = vmatmul.mubr.msk.f32.vlgmr.msra.gmra.mxu0 %vm271_vm4, %v3019_v49  ;;  %v4438_v2 = vpop.eup %4437  ;;  %4304 = vmatpush3.msra.mxu1 %v1970_v1 }
 0xdc7   :  { %4289 = vmatpush3.msra.mxu0 %v3186_v61  ;;  %4290 = vmatprep.mubr.msk.f32.mxu0 %vm4496_vm3, %v4495_v19  ;;  %v3349_v5 = vmul.f32 %v4438_v2, %v4938_v29  ;;  %v1973_v2 = vld [vmem:[#allocation2 + $0x90] sm:$0xff] }
 0xdc8   :  { %4298 = vmatprep.subr.mxu0 %v4495_v19  ;;  %4305 = vmatprep.subr.mxu1 %v1969_v14 }
 0xdc9   :  { %4306 = vmatpush3.msra.mxu1 %v1969_v14  ;;  %v3557_v14 = vrot.slane %v4824_v27, %v1739_v37  ;;  %v1978_v37 = vld [vmem:[#allocation2 + $0xb8] sm:$0xff] }
 0xdca   :  { %4291 = vmatmul.mubr.msk.f32.vlgmr.msra.gmra.mxu0 %vm271_vm4, %v3184_v0  ;;  %4307 = vmatprep.subr.mxu1 %v1968_v9 }
 0xdcb   :  { %4299 = vmatpush3.msra.mxu0 %v3351_v4  ;;  %4300 = vmatprep.mubr.msk.f32.mxu0 %vm4496_vm3, %v4495_v19  ;;  %v1972_v4 = vld [vmem:[#allocation2 + $0x88] sm:$0xff] }
 0xdcc   :  { %4308 = vmatpush3.msra.mxu1 %v1968_v9  ;;  %v3563_v9 = vrot.slane %v4824_v27, %v1745_v33  ;;  %v1976_v33 = vld [vmem:[#allocation2 + $0xa8] sm:$0xff] }
 0xdcd   :  { %4309 = vmatprep.subr.mxu1 %v1967_v22 }
 0xdce   :  { %4301 = vmatmul.mubr.msk.f32.vlgmr.msra.gmra.mxu0 %vm271_vm4, %v3349_v5  ;;  %4310 = vmatpush3.msra.mxu1 %v1967_v22  ;;  %v1971_v5 = vld [vmem:[#allocation2 + $0x80] sm:$0xff] }
 0xdcf   :  { %4325 = vmatprep.subr.mxu1 %v1978_v37 }
 0xe71   :  { %v2251_v6 = vpop.f32.mrf.mxu0 }
 0xe73   :  { %v4232_v7 = vpop.f32.mrf.mxu0 }
 0xe75   :  { %v2416_v11 = vpop.f32.mrf.mxu0 }
 0xe76   :  { %2751 = vrot.lane.b32.xlu0 %v2416_v11, %s4493_s9 }
 0xe77   :  { %v4242_v12 = vpop.f32.mrf.mxu0 }
 0xe79   :  { %v2581_v13 = vpop.f32.mrf.mxu0 }
 0xe7a   :  { %2755 = vrot.lane.b32.xlu1 %v2581_v13, %s4508_s17 }
 0xe7b   :  { %v4252_v15 = vpop.f32.mrf.mxu0 }
 0xe7e   :  { %v2746_v16 = vpop.f32.mrf.mxu0 }
 0xe7f   :  { %2759 = vrot.lane.b32.xlu1 %v2746_v16, %s4509_s4 }
 0xe80   :  { %v4262_v24 = vpop.f32.mrf.mxu0 }
 0xe82   :  { %v2927_v25 = vpop.f32.mrf.mxu0 }
 0xe84   :  { %v4272_v23 = vpop.f32.mrf.mxu0 }
 0xe86   :  { %v3092_v26 = vpop.f32.mrf.mxu0 }
 0xe87   :  { %3427 = vrot.lane.b32.xlu0 %v3092_v26, %s4493_s9 }
 0xe88   :  { %v4282_v18 = vpop.f32.mrf.mxu0 }
 0xe8a   :  { %v3257_v17 = vpop.f32.mrf.mxu0 }
 0xe8b   :  { %3431 = vrot.lane.b32.xlu0 %v3257_v17, %s4508_s17  ;;  %v1977_v17 = vld [vmem:[#allocation2 + $0xb0] sm:$0xff] }
 0xe8c   :  { %v4292_v28 = vpop.f32.mrf.mxu0 }
 0xe8d   :  { %v1975_v28 = vld [vmem:[#allocation2 + $0xa0] sm:$0xff] }
 0xe8e   :  { %v3422_v29 = vpop.f32.mrf.mxu0 }
 0xe8f   :  { %3435 = vrot.lane.b32.xlu1 %v3422_v29, %s4509_s4  ;;  %v3569_v29 = vrot.slane %v4824_v27, %v1751_v52 }
 0xe90   :  { %v4302_v30 = vpop.f32.mrf.mxu0 }
 0xee8   :  { %v2752_v31 = vpop.permute.xlu0 %2751 }
 0xee9   :  { %v2762_v32 = vsel %vm271_vm4, %v2251_v6, %v2752_v31 }
 0xeec   :  { %v2756_v47 = vpop.permute.xlu1 %2755 }
 0xeed   :  { %v2763_v34 = vsel %vm943_vm5, %v2762_v32, %v2756_v47 }
 0xef1   :  { %v2760_v35 = vpop.permute.xlu1 %2759 }
 0xef2   :  { %v2764_v36 = vsel %vm945_vm6, %v2763_v34, %v2760_v35 }
 0xef3   :  { %4311 = vmatprep.mubr.msk.f32.mxu1 %vm160_vm2, %v2764_v36  ;;  %v3656_v36 = vrot.slane %v4824_v27, %v1838_v59 }
 0xef9   :  { %v3428_v38 = vpop.permute.xlu0 %3427 }
 0xefa   :  { %v3438_v40 = vsel %vm271_vm4, %v2927_v25, %v3428_v38 }
 0xefd   :  { %v3432_v39 = vpop.permute.xlu0 %3431 }
 0xefe   :  { %v3439_v41 = vsel %vm943_vm5, %v3438_v40, %v3432_v39 }
 0xf01   :  { %v3436_v42 = vpop.permute.xlu1 %3435 }
 0xf02   :  { %v3440_v43 = vsel %vm945_vm6, %v3439_v41, %v3436_v42 }
 0xf03   :  { %4312 = vmatmul.mubr.msk.f32.vlgmr.msra.gmra.mxu1 %vm160_vm2, %v3440_v43 }
 0xf04   :  { %4326 = vmatpush3.msra.mxu1 %v1978_v37 }
 0xf05   :  { %4327 = vmatprep.subr.mxu1 %v1977_v17 }
 0xf06   :  { %4328 = vmatpush3.msra.mxu1 %v1977_v17 }
 0xf07   :  { %4329 = vmatprep.subr.mxu1 %v1976_v33 }
 0xf08   :  { %4330 = vmatpush3.msra.mxu1 %v1976_v33 }
 0xf09   :  { %4331 = vmatprep.subr.mxu1 %v1975_v28 }
 0xf0a   :  { %4332 = vmatpush3.msra.mxu1 %v1975_v28 }
 0xfc3   :  { %v4313_v48 = vpop.f32.mrf.mxu1 }
 0xfc4   :  { %v3523_v50 = vadd.f32 %v4313_v48, %v3444_v44 }
 0xfc5   :  { %v3517_v51 = vpop.f32.mrf.mxu1 }
 0xfc6   :  { %v3527_v53 = vadd.f32 %v3523_v50, %v4836_v46  ;;  %v3518_v54 = vadd.f32 %v3517_v51, %v3444_v44 }
 0xfc8   :  { %v3526_v55 = vadd.f32 %v3518_v54, %v4834_v45  ;;  %v3531_v3 = vsel %vm160_vm2, %v3527_v53, 0.0  ;;  %v1974_v45 = vld [vmem:[#allocation2 + $0x98] sm:$0xff] }
 0xfc9   :  { %3532 = vadd.xlane.f32.xlu1 %v3531_v3  ;;  %4314 = vmatprep.subr.mxu0 %v1974_v45 }
 0xfca   :  { %v3528_v20 = vsel %vm160_vm2, %v3526_v55, 0.0  ;;  %4315 = vmatpush3.msra.mxu0 %v1974_v45 }
 0xfcb   :  { %3529 = vadd.xlane.f32.xlu0 %v3528_v20  ;;  %4316 = vmatprep.subr.mxu0 %v1973_v2  ;;  %v3789_v20 = vld [vmem:[%s5059_s6 + $0x18] sm:$0xff] }
 0xfcc   :  { %4317 = vmatpush3.msra.mxu0 %v1973_v2 }
 0xfcd   :  { %4318 = vmatprep.subr.mxu0 %v1972_v4 }
 0xfce   :  { %4319 = vmatpush3.msra.mxu0 %v1972_v4 }
 0xfcf   :  { %4320 = vmatprep.subr.mxu0 %v1971_v5 }
 0xfd0   :  { %4321 = vmatpush3.msra.mxu0 %v1971_v5 }
 0xfd1   :  { %4336 = vmatprep.subr.mxu0 %v4495_v19 }
0x1052   :  { %v3533_v56 = vpop.xlane.xlu1 %3532 }
0x1053   :  { %v3535_v57 = vmul.f32 0.03125, %v3533_v56  ;;  %v3788_v56 = vld [vmem:[%s5059_s6 + $0x10] sm:$0xff] }
0x1054   :  { %v3530_v58 = vpop.xlane.xlu0 %3529 }
0x1055   :  { %v3534_v60 = vmul.f32 0.03125, %v3530_v58  ;;  %v3537_v49 = vsub.f32 %v3527_v53, %v3535_v57  ;;  %v3787_v57 = vld [vmem:[%s5059_s6 + $0x8] sm:$0xff]  ;;  %v3786_v58 = vld [vmem:[%s5059_s6] sm:$0xff] }
0x1057   :  { %v3536_v63 = vsub.f32 %v3526_v55, %v3534_v60  ;;  %v3539_v0 = vmul.f32 %v3537_v49, %v3537_v49 }
0x1059   :  { %v3538_v61 = vmul.f32 %v3536_v63, %v3536_v63  ;;  %v3543_v46 = vsel %vm160_vm2, %v3539_v0, 0.0 }
0x105b   :  { %v3540_v62 = vsel %vm160_vm2, %v3538_v61, 0.0 }
0x105c   :  { %3541 = vadd.xlane.f32.xlu0 %v3540_v62 }
0x1060   :  { %3544 = vadd.xlane.f32.xlu0 %v3543_v46  ;;  %v3928_v46 = vld [vmem:[%s5058_s5 + $0x18] sm:$0x3] }
0x1061   :  { %v3769_v45 = vrot.slane %v3928_v46, %v4614_v21  ;;  %v3775_v5 = vrot.slane %v3928_v46, %v4589_v10  ;;  %v3961_v21 = vld [vmem:[%s5060_s7] ss:$0 sm:$0xff] }
0x10e5   :  { %v3542_v6 = vpop.xlane.xlu0 %3541 }
0x10e6   :  { %v3546_v7 = vmul.f32 0.03125, %v3542_v6 }
0x10e8   :  { %v3548_v11 = vadd.f32 1e-12, %v3546_v7 }
0x10e9   :  { %v3545_v12 = vpop.xlane.xlu0 %3544 }
0x10ea   :  { %4439 = vrsqrt.f32 %v3548_v11  ;;  %v3547_v13 = vmul.f32 0.03125, %v3545_v12 }
0x10ec   :  { %v3549_v1 = vadd.f32 1e-12, %v3547_v13 }
0x10ee   :  { %4441 = vrsqrt.f32 %v3549_v1 }
0x10f7   :  { %v4440_v15 = vpop.eup %4439 }
0x10f8   :  { %v3552_v16 = vmul.f32 %v4440_v15, %v3536_v63 }
0x10fa   :  { %v3558_v22 = vmul.f32 %v3557_v14, %v3552_v16 }
0x10fb   :  { %v4442_v24 = vpop.eup %4441 }
0x10fc   :  { %v3553_v25 = vmul.f32 %v4442_v24, %v3537_v49  ;;  %v3564_v23 = vadd.f32 %v3563_v9, %v3558_v22 }
0x10fe   :  { %v3559_v26 = vmul.f32 %v3557_v14, %v3553_v25  ;;  %4322 = vmatprep.mubr.msk.f32.mxu0 %vm160_vm2, %v3564_v23 }
0x1100   :  { %v3565_v18 = vadd.f32 %v3563_v9, %v3559_v26 }
0x1102   :  { %4323 = vmatmul.mubr.msk.f32.vlgmr.msra.gmra.mxu0 %vm160_vm2, %v3565_v18 }
0x1103   :  { %4344 = vmatprep.mubr.msk.f32.mxu0 %vm4496_vm3, %v4495_v19  ;;  %4337 = vmatpush3.msra.mxu0 %v3789_v20 }
0x1104   :  { %4338 = vmatprep.subr.mxu0 %v4495_v19 }
0x1105   :  { %4339 = vmatpush3.msra.mxu0 %v3788_v56 }
0x1106   :  { %4340 = vmatprep.subr.mxu0 %v4495_v19 }
0x1107   :  { %4341 = vmatpush3.msra.mxu0 %v3787_v57 }
0x1108   :  { %4342 = vmatprep.subr.mxu0 %v4495_v19 }
0x1109   :  { %4343 = vmatpush3.msra.mxu0 %v3786_v58 }
0x11c2   :  { %v4324_v30 = vpop.f32.mrf.mxu0 }
0x11c3   :  { %v3648_v47 = vadd.f32 %v4324_v30, %v3569_v29 }
0x11c4   :  { %v3642_v31 = vpop.f32.mrf.mxu0 }
0x11c5   :  { %v3643_v32 = vadd.f32 %v3642_v31, %v3569_v29  ;;  %v3652_v35 = vmax.f32 %v3648_v47, 0.0 }
0x11c7   :  { %v3651_v34 = vmax.f32 %v3643_v32, 0.0 }
0x11c9   :  { %4333 = vmatprep.mubr.msk.f32.mxu1 %vm160_vm2, %v3651_v34 }
0x11ca   :  { %4334 = vmatmul.mubr.msk.f32.vlgmr.msra.gmra.mxu1 %vm160_vm2, %v3652_v35 }
0x128a   :  { %v4335_v38 = vpop.f32.mrf.mxu1 }
0x128b   :  { %v3735_v39 = vadd.f32 %v4335_v38, %v3656_v36 }
0x128c   :  { %v3729_v40 = vpop.f32.mrf.mxu1 }
0x128d   :  { %v3739_v41 = vadd.f32 %v3735_v39, %v3565_v18  ;;  %v3730_v42 = vadd.f32 %v3729_v40, %v3656_v36 }
0x128f   :  { %v3738_v52 = vadd.f32 %v3730_v42, %v3564_v23  ;;  %v3743_v43 = vsel %vm160_vm2, %v3739_v41, 0.0 }
0x1290   :  { %3744 = vadd.xlane.f32.xlu0 %v3743_v43 }
0x1291   :  { %v3740_v44 = vsel %vm160_vm2, %v3738_v52, 0.0 }
0x1292   :  { %3741 = vadd.xlane.f32.xlu1 %v3740_v44 }
0x1319   :  { %v3745_v48 = vpop.xlane.xlu0 %3744 }
0x131a   :  { %v3747_v50 = vmul.f32 0.03125, %v3745_v48 }
0x131b   :  { %v3742_v51 = vpop.xlane.xlu1 %3741 }
0x131c   :  { %v3749_v53 = vsub.f32 %v3739_v41, %v3747_v50  ;;  %v3746_v54 = vmul.f32 0.03125, %v3742_v51 }
0x131e   :  { %v3748_v8 = vsub.f32 %v3738_v52, %v3746_v54  ;;  %v3751_v55 = vmul.f32 %v3749_v53, %v3749_v53 }
0x1320   :  { %v3755_v59 = vsel %vm160_vm2, %v3751_v55, 0.0  ;;  %v3750_v27 = vmul.f32 %v3748_v8, %v3748_v8 }
0x1321   :  { %3756 = vadd.xlane.f32.xlu0 %v3755_v59 }
0x1322   :  { %v3752_v3 = vsel %vm160_vm2, %v3750_v27, 0.0 }
0x1323   :  { %3753 = vadd.xlane.f32.xlu1 %v3752_v3 }
0x13aa   :  { %v3757_v60 = vpop.xlane.xlu0 %3756 }
0x13ab   :  { %v3759_v49 = vmul.f32 0.03125, %v3757_v60 }
0x13ac   :  { %v3754_v63 = vpop.xlane.xlu1 %3753 }
0x13ad   :  { %v3761_v61 = vadd.f32 1e-12, %v3759_v49  ;;  %v3758_v62 = vmul.f32 0.03125, %v3754_v63 }
0x13af   :  { %4443 = vrsqrt.f32 %v3761_v61  ;;  %v3760_v0 = vadd.f32 1e-12, %v3758_v62 }
0x13b1   :  { %4445 = vrsqrt.f32 %v3760_v0 }
0x13bc   :  { %v4444_v2 = vpop.eup %4443 }
0x13bd   :  { %v3765_v4 = vmul.f32 %v4444_v2, %v3749_v53 }
0x13be   :  { %v4446_v19 = vpop.eup %4445 }
0x13bf   :  { %v3764_v6 = vmul.f32 %v4446_v19, %v3748_v8  ;;  %v3771_v7 = vmul.f32 %v3769_v45, %v3765_v4 }
0x13c1   :  { %v3770_v11 = vmul.f32 %v3769_v45, %v3764_v6  ;;  %v3777_v12 = vadd.f32 %v3775_v5, %v3771_v7 }
0x13c3   :  { %v3776_v13 = vadd.f32 %v3775_v5, %v3770_v11  ;;  %v3782_v14 = vrot.slane %v3777_v12, 6 }
0x13c5   :  { %v3779_v1 = vrot.slane %v3776_v13, 7 }
0x13c7   :  { %v3785_v15 = vsel %vm3784_vm7, %v3779_v1, %v3782_v14 }
0x13c8   :  { %4345 = vmatmul.mubr.msk.f32.vlgmr.msra.gmra.mxu0 %vm160_vm2, %v3785_v15 }
0x1488   :  { %v3866_v16 = vpop.f32.mrf.mxu0 }
0x1489   :  { %v3867_v10 = vadd.f32 %v3961_v21, %v3866_v16 }
0x148a   :  { %v4346_v9 = vpop.f32.mrf.mxu0 }
0x148b   :  { %3871 = vst.msk [vmem:[#allocation5] sm:$0x3] %vm3870_vm8, %v3867_v10 }
0x148c   :  { %4478 = shalt.err (!%p4475_p9)
}
0x148d   :  { %3881 = dma.vmem_to_hbm [thread:$0]  %s3879_s15, 32, %s5061_s8, [#allocation4]  }
0x148e   :  { %4489 = dma.done.wait [#allocation4], 32  }
0x148f   :  { %4490 = vsyncadd [#allocation4], 4294967264 }
0x1490   :  { %3885 = vsyncpa [#allocation3], 1 }
0x1491   :  { %3886 = vsyncpa [#allocation4], 1 }

</bundles_post_ra>
